<compile_context>
chip_gen: v6e
topology: v6e:2x2x1
jax: 0.10.0
libtpu: 0.0.40
codegen_flags: <defaults>
</compile_context>

<pallas_src>
import math

import jax
import jax.numpy as jnp
from jax import lax
from jax.experimental import pallas as pl
from jax.experimental.pallas import tpu as pltpu

# ----------------------------- small config ---------------------------------
B, S, D = 2, 16, 64           # batch, seq, model dim
H, KVH = 4, 2                 # query heads, kv heads (GQA)
HD = D // H                   # head_dim = 16
NREP = H // KVH               # kv repeat factor = 2
QD = H * HD                   # 64
KVD = KVH * HD                # 32
QKVD = QD + 2 * KVD           # 128 (packed, lane-dense QKV width)
MULTIPLE_OF = 32
EPS = 1e-5
ROPE_THETA = 10000.0
MAX_SEQ = 32                  # max_seq_len for the KV cache


def _ffn_hidden(dim, multiple_of):
    hidden = int(2 * (4 * dim) / 3)
    return multiple_of * ((hidden + multiple_of - 1) // multiple_of)


HID = _ffn_hidden(D, MULTIPLE_OF)   # 192


# ----------------------------- fused kernel ----------------------------------
def _rmsnorm(x, w):
    ms = jnp.mean(x * x, axis=-1, keepdims=True)
    return x * lax.rsqrt(ms + EPS) * w


def _make_block_kernel(start_pos):
    T = start_pos + S
    f32, bf16 = jnp.float32, jnp.bfloat16

    def kernel(x_ref, an_ref, fn_ref, wqkv_ref, wo_ref, w13_ref, w2_ref,
               cosf_ref, sinf_ref, ck_in_ref, cv_in_ref,
               out_ref, ck_out_ref, cv_out_ref):
        x = x_ref[0]                                                # (S, D) f32

        # ---- RMSNorm(attention_norm) + packed QKV projection (one matmul);
        #      1/sqrt(HD) already folded into the wq columns. ----
        xn = _rmsnorm(x, an_ref[...])
        qkv = jnp.dot(xn.astype(bf16), wqkv_ref[...],
                      preferred_element_type=f32)                   # (S, 128)

        # ---- RoPE via lane rolls + parity select (VPU/XLU, no MXU pass).
        #      v lanes pass through (cos=1, sin=0). ----
        parity = lax.broadcasted_iota(jnp.int32, (S, QKVD), 1) % 2
        prev = pltpu.roll(qkv, shift=1, axis=1)           # prev[:, j] = qkv[:, j-1]
        nxt = pltpu.roll(qkv, shift=QKVD - 1, axis=1)     # nxt[:, j]  = qkv[:, j+1]
        rot = jnp.where(parity == 0, -nxt, prev)          # pair swap with sign
        qkv = qkv * cosf_ref[...] + rot * sinf_ref[...]

        qkv_bf = qkv.astype(bf16)                          # single cast of (S,128)
        xq = qkv_bf[:, :QD]                                # (S, 64)
        xk = qkv_bf[:, QD:QD + KVD]                        # (S, 32)
        xv = qkv_bf[:, QD + KVD:]                          # (S, 32)

        # ---- KV-cache: write only the new (S, KVD) window (bf16).  Untouched
        #      rows stay in HBM thanks to input_output_aliases. ----
        ck_out_ref[0] = xk
        cv_out_ref[0] = xv

        if start_pos == 0:
            keys, values = xk, xv                          # (T=S, KVD) bf16
        else:
            keys = jnp.concatenate([ck_in_ref[0], xk], axis=0)     # (T, KVD)
            values = jnp.concatenate([cv_in_ref[0], xv], axis=0)

        # ---- GQA-grouped attention: KVH batched matmuls at M = NREP*S ----
        # group g rows are [head (g*NREP+r), all S positions] for r=0..NREP-1
        q3 = jnp.stack([
            jnp.concatenate(
                [xq[:, (g * NREP + r) * HD:(g * NREP + r + 1) * HD]
                 for r in range(NREP)], axis=0)
            for g in range(KVH)], axis=0)                  # (KVH, NREP*S, HD)
        k3 = jnp.stack([keys[:, g * HD:(g + 1) * HD] for g in range(KVH)],
                       axis=0)                             # (KVH, T, HD)
        v3 = jnp.stack([values[:, g * HD:(g + 1) * HD] for g in range(KVH)],
                       axis=0)

        scores = jnp.einsum("gmd,gtd->gmt", q3, k3,
                            preferred_element_type=f32)    # (KVH, NREP*S, T)

        # causal mask generated in-kernel (row m within a group -> s = m % S)
        m_i = lax.broadcasted_iota(jnp.int32, (NREP * S, T), 0)
        t_i = lax.broadcasted_iota(jnp.int32, (NREP * S, T), 1)
        bias = jnp.where(t_i <= start_pos + (m_i % S), 0.0, -1e30)
        scores = scores + bias[None, :, :]

        mx = jnp.max(scores, axis=-1, keepdims=True)
        e = jnp.exp(scores - mx)
        p = e * pl.reciprocal(jnp.sum(e, axis=-1, keepdims=True), approx=True)
        attn3 = jnp.einsum("gmt,gtd->gmd", p.astype(bf16), v3,
                           preferred_element_type=f32)     # (KVH, NREP*S, HD)

        # back to (S, QD) head-major lanes, then one (S,64)@(64,64) wo matmul
        attn = jnp.concatenate(
            [attn3[h // NREP, (h % NREP) * S:(h % NREP + 1) * S, :]
             for h in range(H)], axis=-1)                  # (S, 64) f32
        h_res = x + jnp.dot(attn.astype(bf16), wo_ref[...],
                            preferred_element_type=f32)    # (S, D)

        # ---- RMSNorm(ffn_norm) + SwiGLU FFN (packed w1|w3) + residual ----
        hn = _rmsnorm(h_res, fn_ref[...]).astype(bf16)
        ab = jnp.dot(hn, w13_ref[...], preferred_element_type=f32)  # (S, 2*HID)
        a = ab[:, :HID]
        b = ab[:, HID:]
        act = (a * jax.nn.sigmoid(a)) * b                  # f32 SiLU gate
        out_ref[0] = h_res + jnp.dot(act.astype(bf16), w2_ref[...],
                                     preferred_element_type=f32)

    return kernel


# ----------------------------- wrapper ---------------------------------------
def _rep_spec(shape):
    nd = len(shape)
    return pl.BlockSpec(tuple(shape), lambda b, _nd=nd: (0,) * _nd)


def _batched_spec(shape):
    nd = len(shape)
    return pl.BlockSpec((1,) + tuple(shape[1:]),
                        lambda b, _nd=nd: (b,) + (0,) * (_nd - 1))


def transformer_block_forward(x, params, start_pos, angles, cache_k, cache_v):
    """One TransformerBlock step. start_pos is a static Python int.

    Returns (out, new_cache_k, new_cache_v): torch mutates self.cache_k/v in
    place; here the updated caches are functional outputs (aliased in-kernel,
    only the new (S, KVD) window is written back). Caches are bf16.
    angles: (S, HD//2) rotary angles for positions [start_pos, start_pos+S).
    """
    assert start_pos % S == 0, "cache write window must land on an S block"
    f32, bf16 = jnp.float32, jnp.bfloat16
    scale = 1.0 / math.sqrt(HD)

    # interleave-expanded cos/sin tiled to the packed (S, 128) QKV layout
    cos2 = jnp.repeat(jnp.cos(angles), 2, axis=-1).astype(f32)      # (S, HD)
    sin2 = jnp.repeat(jnp.sin(angles), 2, axis=-1).astype(f32)
    cosf = jnp.concatenate([jnp.tile(cos2, (1, H)), jnp.tile(cos2, (1, KVH)),
                            jnp.ones((S, KVD), f32)], axis=1)       # (S, 128)
    sinf = jnp.concatenate([jnp.tile(sin2, (1, H)), jnp.tile(sin2, (1, KVH)),
                            jnp.zeros((S, KVD), f32)], axis=1)

    # pack wq|wk|wv (score scale folded into wq, exact power of 2) and w1|w3
    wqkv = jnp.concatenate([params["wq"] * scale, params["wk"], params["wv"]],
                           axis=1).astype(bf16)                     # (D, 128)
    wo = params["wo"].astype(bf16)
    w13 = jnp.concatenate([params["w1"], params["w3"]], axis=1).astype(bf16)
    w2 = params["w2"].astype(bf16)

    ck = cache_k.reshape(B, MAX_SEQ, KVD)          # bf16, no cast/copy
    cv = cache_v.reshape(B, MAX_SEQ, KVD)

    # cache input: only the past [:start_pos]; cache output: only the new
    # (S, KVD) window at start_pos (rest of the cache stays in HBM, aliased).
    if start_pos == 0:
        cache_in_spec = pl.BlockSpec((1, S, KVD), lambda b: (b, 0, 0))  # unused
    else:
        cache_in_spec = pl.BlockSpec((1, start_pos, KVD), lambda b: (b, 0, 0))
    sp_blk = start_pos // S
    cache_out_spec = pl.BlockSpec((1, S, KVD), lambda b: (b, sp_blk, 0))

    out, ck_new, cv_new = pl.pallas_call(
        _make_block_kernel(start_pos),
        out_shape=(jax.ShapeDtypeStruct((B, S, D), f32),
                   jax.ShapeDtypeStruct((B, MAX_SEQ, KVD), bf16),
                   jax.ShapeDtypeStruct((B, MAX_SEQ, KVD), bf16)),
        grid=(B,),
        in_specs=[_batched_spec((B, S, D)),                 # 0 x
                  _rep_spec((1, D)),                        # 1 attn_norm
                  _rep_spec((1, D)),                        # 2 ffn_norm
                  _rep_spec((D, QKVD)),                     # 3 wqkv (scaled q)
                  _rep_spec((QD, D)),                       # 4 wo
                  _rep_spec((D, 2 * HID)),                  # 5 w1|w3 packed
                  _rep_spec((HID, D)),                      # 6 w2
                  _rep_spec((S, QKVD)),                     # 7 cos
                  _rep_spec((S, QKVD)),                     # 8 sin
                  cache_in_spec,                            # 9 cache_k (past)
                  cache_in_spec],                           # 10 cache_v (past)
        out_specs=(_batched_spec((B, S, D)),
                   cache_out_spec,
                   cache_out_spec),
        input_output_aliases={9: 1, 10: 2},                 # in-place cache write
        compiler_params=pltpu.CompilerParams(
            dimension_semantics=("parallel",)),             # v7x: 2 TCs over batch
    )(x, params["attn_norm"], params["ffn_norm"], wqkv, wo, w13, w2,
      cosf, sinf, ck, cv)

    return (out,
            ck_new.reshape(B, MAX_SEQ, KVH, HD),
            cv_new.reshape(B, MAX_SEQ, KVH, HD))


# ----------------------------- pure-JAX reference ----------------------------
def ref_forward(x, p, start_pos, angles, mask, cache_k, cache_v):
    def rmsnorm(v, w):
        return v * lax.rsqrt(jnp.mean(v * v, -1, keepdims=True) + EPS) * w

    xn = rmsnorm(x, p["attn_norm"])
    xq = (xn @ p["wq"]).reshape(B, S, H, HD)
    xk = (xn @ p["wk"]).reshape(B, S, KVH, HD)
    xv = (xn @ p["wv"]).reshape(B, S, KVH, HD)

    cos = jnp.cos(angles)[None, :, None, :]
    sin = jnp.sin(angles)[None, :, None, :]

    def rope(t):
        tr = t.reshape(t.shape[:-1] + (HD // 2, 2))
        re, im = tr[..., 0], tr[..., 1]
        return jnp.stack([re * cos - im * sin, re * sin + im * cos], -1).reshape(t.shape)

    xq, xk = rope(xq), rope(xk)
    cache_k = lax.dynamic_update_slice(cache_k, xk, (0, start_pos, 0, 0))
    cache_v = lax.dynamic_update_slice(cache_v, xv, (0, start_pos, 0, 0))
    T = start_pos + S
    keys = jnp.repeat(cache_k[:B, :T], NREP, axis=2)
    values = jnp.repeat(cache_v[:B, :T], NREP, axis=2)

    q = xq.transpose(0, 2, 1, 3)
    k = keys.transpose(0, 2, 1, 3)
    v = values.transpose(0, 2, 1, 3)
    scores = jnp.einsum("bhsd,bhtd->bhst", q, k) / math.sqrt(HD) + mask
    probs = jax.nn.softmax(scores.astype(jnp.float32), axis=-1)
    attn = jnp.einsum("bhst,bhtd->bhsd", probs, v)
    attn = attn.transpose(0, 2, 1, 3).reshape(B, S, H * HD)
    h = x + attn @ p["wo"]
    hn = rmsnorm(h, p["ffn_norm"])
    out = h + (jax.nn.silu(hn @ p["w1"]) * (hn @ p["w3"])) @ p["w2"]
    return out, cache_k, cache_v


# ----------------------------- main ------------------------------------------
if __name__ == "__main__":
    key = jax.random.PRNGKey(0)
    ks = jax.random.split(key, 8)

    def winit(k, shape):
        return (0.02 * jax.random.normal(k, shape)).astype(jnp.float32)

    params = {
        "attn_norm": jnp.ones((1, D), jnp.float32),
        "ffn_norm": jnp.ones((1, D), jnp.float32),
        "wq": winit(ks[1], (D, QD)),
        "wk": winit(ks[2], (D, KVD)),
        "wv": winit(ks[3], (D, KVD)),
        "wo": winit(ks[4], (QD, D)),
        "w1": winit(ks[5], (D, HID)),
        "w3": winit(ks[6], (D, HID)),
        "w2": winit(ks[7], (HID, D)),
    }

    x = jax.random.normal(ks[0], (B, S, D), jnp.float32)
    start_pos = 0
    cache_k = jnp.zeros((B, MAX_SEQ, KVH, HD), jnp.bfloat16)   # bf16 cache
    cache_v = jnp.zeros((B, MAX_SEQ, KVH, HD), jnp.bfloat16)

    # rotary angles for positions [start_pos, start_pos+S)
    inv_freq = 1.0 / (ROPE_THETA ** (jnp.arange(0, HD, 2, dtype=jnp.float32) / HD))
    t = jnp.arange(start_pos, start_pos + S, dtype=jnp.float32)
    angles = jnp.outer(t, inv_freq)                        # (S, HD//2)

    fwd = jax.jit(transformer_block_forward, static_argnums=(2,))
    out, new_ck, new_cv = fwd(x, params, start_pos, angles, cache_k, cache_v)
    out = jax.block_until_ready(out)

    # reference (f32 cache, explicit additive causal mask)
    T = start_pos + S
    causal = jnp.triu(jnp.full((S, S), -1e30, jnp.float32), k=1)
    mask = jnp.concatenate([jnp.zeros((S, start_pos), jnp.float32), causal], axis=1)
    ref_out, ref_ck, ref_cv = ref_forward(x, params, start_pos, angles, mask,
                                          cache_k.astype(jnp.float32),
                                          cache_v.astype(jnp.float32))

    assert out.shape == (B, S, D)
    assert jnp.allclose(out, ref_out, atol=2e-2, rtol=2e-2), \
        f"out max abs diff {jnp.max(jnp.abs(out - ref_out))}"
    assert jnp.allclose(new_ck.astype(jnp.float32), ref_ck, atol=2e-2, rtol=2e-2), \
        f"cache_k max abs diff {jnp.max(jnp.abs(new_ck.astype(jnp.float32) - ref_ck))}"
    assert jnp.allclose(new_cv.astype(jnp.float32), ref_cv, atol=2e-2, rtol=2e-2), \
        f"cache_v max abs diff {jnp.max(jnp.abs(new_cv.astype(jnp.float32) - ref_cv))}"

    print("KERNEL_OK")
</pallas_src>

<mosaic_0001>
module attributes {stable_mosaic.version = 11 : i64} {
  func.func @kernel(%arg0: i32, %arg1: memref<1x16x64xf32, #tpu.memory_space<vmem>>, %arg2: memref<1x64xf32, #tpu.memory_space<vmem>>, %arg3: memref<1x64xf32, #tpu.memory_space<vmem>>, %arg4: memref<64x128xbf16, #tpu.memory_space<vmem>>, %arg5: memref<64x64xbf16, #tpu.memory_space<vmem>>, %arg6: memref<64x384xbf16, #tpu.memory_space<vmem>>, %arg7: memref<192x64xbf16, #tpu.memory_space<vmem>>, %arg8: memref<16x128xf32, #tpu.memory_space<vmem>>, %arg9: memref<16x128xf32, #tpu.memory_space<vmem>>, %arg10: memref<1x16x32xbf16, #tpu.memory_space<vmem>>, %arg11: memref<1x16x32xbf16, #tpu.memory_space<vmem>>, %arg12: memref<1x16x64xf32, #tpu.memory_space<vmem>>, %arg13: memref<1x16x32xbf16, #tpu.memory_space<vmem>>, %arg14: memref<1x16x32xbf16, #tpu.memory_space<vmem>>) attributes {dimension_semantics = [#tpu.dimension_semantics<parallel>], iteration_bounds = array<i64: 2>, scalar_prefetch = 0 : i64, scratch_operands = 0 : i64, tpu.core_type = #tpu.core_type<tc>, window_params = [{transform_indices = @transform_0, window_bounds = array<i64: 1, 16, 64>}, {pipeline_mode = #tpu.pipeline_mode<synchronous>, transform_indices = @transform_1, window_bounds = array<i64: 1, 64>}, {pipeline_mode = #tpu.pipeline_mode<synchronous>, transform_indices = @transform_2, window_bounds = array<i64: 1, 64>}, {pipeline_mode = #tpu.pipeline_mode<synchronous>, transform_indices = @transform_3, window_bounds = array<i64: 64, 128>}, {pipeline_mode = #tpu.pipeline_mode<synchronous>, transform_indices = @transform_4, window_bounds = array<i64: 64, 64>}, {pipeline_mode = #tpu.pipeline_mode<synchronous>, transform_indices = @transform_5, window_bounds = array<i64: 64, 384>}, {pipeline_mode = #tpu.pipeline_mode<synchronous>, transform_indices = @transform_6, window_bounds = array<i64: 192, 64>}, {pipeline_mode = #tpu.pipeline_mode<synchronous>, transform_indices = @transform_7, window_bounds = array<i64: 16, 128>}, {pipeline_mode = #tpu.pipeline_mode<synchronous>, transform_indices = @transform_8, window_bounds = array<i64: 16, 128>}, {transform_indices = @transform_9, window_bounds = array<i64: 1, 16, 32>}, {transform_indices = @transform_10, window_bounds = array<i64: 1, 16, 32>}, {transform_indices = @transform_11, window_bounds = array<i64: 1, 16, 64>}, {transform_indices = @transform_12, window_bounds = array<i64: 1, 16, 32>}, {transform_indices = @transform_13, window_bounds = array<i64: 1, 16, 32>}]} {
    %c0 = arith.constant 0 : index
    %c0_0 = arith.constant 0 : index
    %c0_1 = arith.constant 0 : index
    %0 = vector.load %arg1[%c0, %c0_0, %c0_1] : memref<1x16x64xf32, #tpu.memory_space<vmem>>, vector<1x16x64xf32>
    %1 = vector.shape_cast %0 : vector<1x16x64xf32> to vector<16x64xf32>
    %c0_2 = arith.constant 0 : index
    %c0_3 = arith.constant 0 : index
    %2 = vector.load %arg2[%c0_2, %c0_3] : memref<1x64xf32, #tpu.memory_space<vmem>>, vector<1x64xf32>
    %3 = arith.mulf %1, %1 : vector<16x64xf32>
    %cst = arith.constant dense<0.000000e+00> : vector<16xf32>
    %4 = vector.multi_reduction <add>, %3, %cst [1] : vector<16x64xf32> to vector<16xf32>
    %5 = vector.shape_cast %4 : vector<16xf32> to vector<16x1xf32>
    %cst_4 = arith.constant 6.400000e+01 : f32
    %6 = vector.broadcast %cst_4 : f32 to vector<16x1xf32>
    %7 = arith.divf %5, %6 : vector<16x1xf32>
    %cst_5 = arith.constant 9.99999974E-6 : f32
    %8 = vector.broadcast %cst_5 : f32 to vector<16x1xf32>
    %9 = arith.addf %7, %8 : vector<16x1xf32>
    %10 = math.rsqrt %9 : vector<16x1xf32>
    %11 = vector.broadcast %10 : vector<16x1xf32> to vector<16x64xf32>
    %12 = arith.mulf %1, %11 : vector<16x64xf32>
    %13 = vector.broadcast %2 : vector<1x64xf32> to vector<16x64xf32>
    %14 = arith.mulf %12, %13 : vector<16x64xf32>
    %15 = arith.truncf %14 : vector<16x64xf32> to vector<16x64xbf16>
    %c0_6 = arith.constant 0 : index
    %c0_7 = arith.constant 0 : index
    %16 = vector.load %arg4[%c0_6, %c0_7] : memref<64x128xbf16, #tpu.memory_space<vmem>>, vector<64x128xbf16>
    %cst_8 = arith.constant dense<0.000000e+00> : vector<16x128xf32>
    %17 = tpu.matmul %15, %16, %cst_8 {dimension_numbers = #tpu.dot_dimension_numbers<[1], [0], [0], [1], [0, 0, 1, 1], [], []>} : vector<16x64xbf16>, vector<64x128xbf16>, vector<16x128xf32> -> vector<16x128xf32>
    %18 = tpu.iota {dimensions = array<i32: 1>} : vector<16x128xi32>
    %c2_i32 = arith.constant 2 : i32
    %c0_i32 = arith.constant 0 : i32
    %19 = arith.cmpi eq, %c2_i32, %c0_i32 : i32
    %c1_i32 = arith.constant 1 : i32
    %20 = arith.select %19, %c1_i32, %c2_i32 : i32
    %21 = vector.broadcast %20 : i32 to vector<16x128xi32>
    %22 = arith.remsi %18, %21 : vector<16x128xi32>
    %c0_i32_9 = arith.constant 0 : i32
    %23 = vector.broadcast %c0_i32_9 : i32 to vector<16x128xi32>
    %24 = arith.cmpi ne, %22, %23 : vector<16x128xi32>
    %c0_i32_10 = arith.constant 0 : i32
    %25 = vector.broadcast %c0_i32_10 : i32 to vector<16x128xi32>
    %26 = arith.cmpi slt, %22, %25 : vector<16x128xi32>
    %c0_i32_11 = arith.constant 0 : i32
    %27 = arith.cmpi slt, %20, %c0_i32_11 : i32
    %28 = vector.broadcast %27 : i1 to vector<16x128xi1>
    %29 = vector.broadcast %28 : vector<16x128xi1> to vector<16x128xi1>
    %30 = arith.xori %26, %29 : vector<16x128xi1>
    %31 = arith.andi %30, %24 : vector<16x128xi1>
    %32 = vector.broadcast %20 : i32 to vector<16x128xi32>
    %33 = arith.addi %22, %32 : vector<16x128xi32>
    %34 = arith.select %31, %33, %22 : vector<16x128xi1>, vector<16x128xi32>
    %c1_i32_12 = arith.constant 1 : i32
    %35 = tpu.dynamic_rotate %17 by %c1_i32_12 dim 1 : vector<16x128xf32>, i32 -> vector<16x128xf32>
    %c127_i32 = arith.constant 127 : i32
    %36 = tpu.dynamic_rotate %17 by %c127_i32 dim 1 : vector<16x128xf32>, i32 -> vector<16x128xf32>
    %c0_i32_13 = arith.constant 0 : i32
    %37 = vector.broadcast %c0_i32_13 : i32 to vector<16x128xi32>
    %38 = arith.cmpi eq, %34, %37 : vector<16x128xi32>
    %cst_14 = arith.constant 0.000000e+00 : f32
    %39 = vector.broadcast %cst_14 : f32 to vector<16x128xf32>
    %40 = arith.subf %39, %36 : vector<16x128xf32>
    %41 = arith.select %38, %40, %35 : vector<16x128xi1>, vector<16x128xf32>
    %c0_15 = arith.constant 0 : index
    %c0_16 = arith.constant 0 : index
    %42 = vector.load %arg8[%c0_15, %c0_16] : memref<16x128xf32, #tpu.memory_space<vmem>>, vector<16x128xf32>
    %43 = arith.mulf %17, %42 : vector<16x128xf32>
    %c0_17 = arith.constant 0 : index
    %c0_18 = arith.constant 0 : index
    %44 = vector.load %arg9[%c0_17, %c0_18] : memref<16x128xf32, #tpu.memory_space<vmem>>, vector<16x128xf32>
    %45 = arith.mulf %41, %44 : vector<16x128xf32>
    %46 = arith.addf %43, %45 : vector<16x128xf32>
    %47 = arith.truncf %46 : vector<16x128xf32> to vector<16x128xbf16>
    %48 = vector.extract_strided_slice %47 {offsets = [0, 0], sizes = [16, 64], strides = [1, 1]} : vector<16x128xbf16> to vector<16x64xbf16>
    %49 = vector.extract_strided_slice %47 {offsets = [0, 64], sizes = [16, 32], strides = [1, 1]} : vector<16x128xbf16> to vector<16x32xbf16>
    %50 = vector.extract_strided_slice %47 {offsets = [0, 96], sizes = [16, 32], strides = [1, 1]} : vector<16x128xbf16> to vector<16x32xbf16>
    %c0_19 = arith.constant 0 : index
    %c0_20 = arith.constant 0 : index
    %c0_21 = arith.constant 0 : index
    %51 = vector.load %arg13[%c0_19, %c0_20, %c0_21] : memref<1x16x32xbf16, #tpu.memory_space<vmem>>, vector<1x16x32xbf16>
    %52 = vector.shape_cast %51 : vector<1x16x32xbf16> to vector<16x32xbf16>
    %53 = vector.shape_cast %49 : vector<16x32xbf16> to vector<1x16x32xbf16>
    tpu.vector_store %arg13[%c0_19, %c0_20, %c0_21], %53 {strides = array<i32>} : memref<1x16x32xbf16, #tpu.memory_space<vmem>>, vector<1x16x32xbf16>,
    %c0_22 = arith.constant 0 : index
    %c0_23 = arith.constant 0 : index
    %c0_24 = arith.constant 0 : index
    %54 = vector.load %arg14[%c0_22, %c0_23, %c0_24] : memref<1x16x32xbf16, #tpu.memory_space<vmem>>, vector<1x16x32xbf16>
    %55 = vector.shape_cast %54 : vector<1x16x32xbf16> to vector<16x32xbf16>
    %56 = vector.shape_cast %50 : vector<16x32xbf16> to vector<1x16x32xbf16>
    tpu.vector_store %arg14[%c0_22, %c0_23, %c0_24], %56 {strides = array<i32>} : memref<1x16x32xbf16, #tpu.memory_space<vmem>>, vector<1x16x32xbf16>,
    %57 = vector.extract_strided_slice %48 {offsets = [0, 0], sizes = [16, 16], strides = [1, 1]} : vector<16x64xbf16> to vector<16x16xbf16>
    %58 = vector.extract_strided_slice %48 {offsets = [0, 16], sizes = [16, 16], strides = [1, 1]} : vector<16x64xbf16> to vector<16x16xbf16>
    %59 = tpu.concatenate %57, %58 in 0 : vector<16x16xbf16>, vector<16x16xbf16> -> vector<32x16xbf16>
    %60 = vector.extract_strided_slice %48 {offsets = [0, 32], sizes = [16, 16], strides = [1, 1]} : vector<16x64xbf16> to vector<16x16xbf16>
    %61 = vector.extract_strided_slice %48 {offsets = [0, 48], sizes = [16, 16], strides = [1, 1]} : vector<16x64xbf16> to vector<16x16xbf16>
    %62 = tpu.concatenate %60, %61 in 0 : vector<16x16xbf16>, vector<16x16xbf16> -> vector<32x16xbf16>
    %63 = vector.shape_cast %59 : vector<32x16xbf16> to vector<1x32x16xbf16>
    %64 = vector.shape_cast %62 : vector<32x16xbf16> to vector<1x32x16xbf16>
    %65 = tpu.concatenate %63, %64 in 0 : vector<1x32x16xbf16>, vector<1x32x16xbf16> -> vector<2x32x16xbf16>
    %66 = vector.extract_strided_slice %49 {offsets = [0, 0], sizes = [16, 16], strides = [1, 1]} : vector<16x32xbf16> to vector<16x16xbf16>
    %67 = vector.extract_strided_slice %49 {offsets = [0, 16], sizes = [16, 16], strides = [1, 1]} : vector<16x32xbf16> to vector<16x16xbf16>
    %68 = vector.shape_cast %66 : vector<16x16xbf16> to vector<1x16x16xbf16>
    %69 = vector.shape_cast %67 : vector<16x16xbf16> to vector<1x16x16xbf16>
    %70 = tpu.concatenate %68, %69 in 0 : vector<1x16x16xbf16>, vector<1x16x16xbf16> -> vector<2x16x16xbf16>
    %71 = vector.extract_strided_slice %50 {offsets = [0, 0], sizes = [16, 16], strides = [1, 1]} : vector<16x32xbf16> to vector<16x16xbf16>
    %72 = vector.extract_strided_slice %50 {offsets = [0, 16], sizes = [16, 16], strides = [1, 1]} : vector<16x32xbf16> to vector<16x16xbf16>
    %73 = vector.shape_cast %71 : vector<16x16xbf16> to vector<1x16x16xbf16>
    %74 = vector.shape_cast %72 : vector<16x16xbf16> to vector<1x16x16xbf16>
    %75 = tpu.concatenate %73, %74 in 0 : vector<1x16x16xbf16>, vector<1x16x16xbf16> -> vector<2x16x16xbf16>
    "tpu.trace_start"() <{level = 10 : i32, message = "gmd,gtd->gmt"}> : () -> ()
    %cst_25 = arith.constant dense<0.000000e+00> : vector<2x32x16xf32>
    %76 = tpu.matmul %65, %70, %cst_25 {dimension_numbers = #tpu.dot_dimension_numbers<[2], [2], [1], [1], [0, 0, 0, 1, 1, 1], [0], [0]>} : vector<2x32x16xbf16>, vector<2x16x16xbf16>, vector<2x32x16xf32> -> vector<2x32x16xf32>
    "tpu.trace_stop"() : () -> ()
    %77 = tpu.iota {dimensions = array<i32: 0>} : vector<32x16xi32>
    %78 = tpu.iota {dimensions = array<i32: 1>} : vector<32x16xi32>
    %c16_i32 = arith.constant 16 : i32
    %c0_i32_26 = arith.constant 0 : i32
    %79 = arith.cmpi eq, %c16_i32, %c0_i32_26 : i32
    %c1_i32_27 = arith.constant 1 : i32
    %80 = arith.select %79, %c1_i32_27, %c16_i32 : i32
    %81 = vector.broadcast %80 : i32 to vector<32x16xi32>
    %82 = arith.remsi %77, %81 : vector<32x16xi32>
    %c0_i32_28 = arith.constant 0 : i32
    %83 = vector.broadcast %c0_i32_28 : i32 to vector<32x16xi32>
    %84 = arith.cmpi ne, %82, %83 : vector<32x16xi32>
    %c0_i32_29 = arith.constant 0 : i32
    %85 = vector.broadcast %c0_i32_29 : i32 to vector<32x16xi32>
    %86 = arith.cmpi slt, %82, %85 : vector<32x16xi32>
    %c0_i32_30 = arith.constant 0 : i32
    %87 = arith.cmpi slt, %80, %c0_i32_30 : i32
    %88 = vector.broadcast %87 : i1 to vector<32x16xi1>
    %89 = vector.broadcast %88 : vector<32x16xi1> to vector<32x16xi1>
    %90 = arith.xori %86, %89 : vector<32x16xi1>
    %91 = arith.andi %90, %84 : vector<32x16xi1>
    %92 = vector.broadcast %80 : i32 to vector<32x16xi32>
    %93 = arith.addi %82, %92 : vector<32x16xi32>
    %94 = arith.select %91, %93, %82 : vector<32x16xi1>, vector<32x16xi32>
    %c0_i32_31 = arith.constant 0 : i32
    %95 = vector.broadcast %c0_i32_31 : i32 to vector<32x16xi32>
    %96 = arith.addi %95, %94 : vector<32x16xi32>
    %97 = arith.cmpi sle, %78, %96 : vector<32x16xi32>
    %cst_32 = arith.constant 0.000000e+00 : f32
    %cst_33 = arith.constant -1.000000e+30 : f32
    %98 = vector.broadcast %cst_32 : f32 to vector<32x16xf32>
    %99 = vector.broadcast %cst_33 : f32 to vector<32x16xf32>
    %100 = arith.select %97, %98, %99 : vector<32x16xi1>, vector<32x16xf32>
    %101 = vector.shape_cast %100 : vector<32x16xf32> to vector<1x32x16xf32>
    %102 = vector.broadcast %101 : vector<1x32x16xf32> to vector<2x32x16xf32>
    %103 = arith.addf %76, %102 : vector<2x32x16xf32>
    %cst_34 = arith.constant dense<0xFF800000> : vector<2x32xf32>
    %104 = vector.multi_reduction <maximumf>, %103, %cst_34 [2] : vector<2x32x16xf32> to vector<2x32xf32>
    %105 = vector.shape_cast %104 : vector<2x32xf32> to vector<2x32x1xf32>
    %106 = vector.broadcast %105 : vector<2x32x1xf32> to vector<2x32x16xf32>
    %107 = arith.subf %103, %106 : vector<2x32x16xf32>
    %108 = math.exp %107 : vector<2x32x16xf32>
    %cst_35 = arith.constant dense<0.000000e+00> : vector<2x32xf32>
    %109 = vector.multi_reduction <add>, %108, %cst_35 [2] : vector<2x32x16xf32> to vector<2x32xf32>
    %110 = vector.shape_cast %109 : vector<2x32xf32> to vector<2x32x1xf32>
    %111 = tpu.reciprocal %110 {approx = true} : vector<2x32x1xf32> -> vector<2x32x1xf32>
    %112 = vector.broadcast %111 : vector<2x32x1xf32> to vector<2x32x16xf32>
    %113 = arith.mulf %108, %112 : vector<2x32x16xf32>
    %114 = arith.truncf %113 : vector<2x32x16xf32> to vector<2x32x16xbf16>
    "tpu.trace_start"() <{level = 10 : i32, message = "gmt,gtd->gmd"}> : () -> ()
    %cst_36 = arith.constant dense<0.000000e+00> : vector<2x32x16xf32>
    %115 = tpu.matmul %114, %75, %cst_36 {dimension_numbers = #tpu.dot_dimension_numbers<[2], [1], [1], [2], [0, 0, 0, 1, 1, 2], [0], [0]>} : vector<2x32x16xbf16>, vector<2x16x16xbf16>, vector<2x32x16xf32> -> vector<2x32x16xf32>
    "tpu.trace_stop"() : () -> ()
    %116 = vector.extract_strided_slice %115 {offsets = [0, 0, 0], sizes = [1, 16, 16], strides = [1, 1, 1]} : vector<2x32x16xf32> to vector<1x16x16xf32>
    %117 = vector.shape_cast %116 : vector<1x16x16xf32> to vector<16x16xf32>
    %118 = vector.extract_strided_slice %115 {offsets = [0, 16, 0], sizes = [1, 16, 16], strides = [1, 1, 1]} : vector<2x32x16xf32> to vector<1x16x16xf32>
    %119 = vector.shape_cast %118 : vector<1x16x16xf32> to vector<16x16xf32>
    %120 = vector.extract_strided_slice %115 {offsets = [1, 0, 0], sizes = [1, 16, 16], strides = [1, 1, 1]} : vector<2x32x16xf32> to vector<1x16x16xf32>
    %121 = vector.shape_cast %120 : vector<1x16x16xf32> to vector<16x16xf32>
    %122 = vector.extract_strided_slice %115 {offsets = [1, 16, 0], sizes = [1, 16, 16], strides = [1, 1, 1]} : vector<2x32x16xf32> to vector<1x16x16xf32>
    %123 = vector.shape_cast %122 : vector<1x16x16xf32> to vector<16x16xf32>
    %124 = tpu.concatenate %117, %119, %121, %123 in 1 : vector<16x16xf32>, vector<16x16xf32>, vector<16x16xf32>, vector<16x16xf32> -> vector<16x64xf32>
    %125 = arith.truncf %124 : vector<16x64xf32> to vector<16x64xbf16>
    %c0_37 = arith.constant 0 : index
    %c0_38 = arith.constant 0 : index
    %126 = vector.load %arg5[%c0_37, %c0_38] : memref<64x64xbf16, #tpu.memory_space<vmem>>, vector<64x64xbf16>
    %cst_39 = arith.constant dense<0.000000e+00> : vector<16x64xf32>
    %127 = tpu.matmul %125, %126, %cst_39 {dimension_numbers = #tpu.dot_dimension_numbers<[1], [0], [0], [1], [0, 0, 1, 1], [], []>} : vector<16x64xbf16>, vector<64x64xbf16>, vector<16x64xf32> -> vector<16x64xf32>
    %128 = arith.addf %1, %127 : vector<16x64xf32>
    %c0_40 = arith.constant 0 : index
    %c0_41 = arith.constant 0 : index
    %129 = vector.load %arg3[%c0_40, %c0_41] : memref<1x64xf32, #tpu.memory_space<vmem>>, vector<1x64xf32>
    %130 = arith.mulf %128, %128 : vector<16x64xf32>
    %cst_42 = arith.constant dense<0.000000e+00> : vector<16xf32>
    %131 = vector.multi_reduction <add>, %130, %cst_42 [1] : vector<16x64xf32> to vector<16xf32>
    %132 = vector.shape_cast %131 : vector<16xf32> to vector<16x1xf32>
    %cst_43 = arith.constant 6.400000e+01 : f32
    %133 = vector.broadcast %cst_43 : f32 to vector<16x1xf32>
    %134 = arith.divf %132, %133 : vector<16x1xf32>
    %cst_44 = arith.constant 9.99999974E-6 : f32
    %135 = vector.broadcast %cst_44 : f32 to vector<16x1xf32>
    %136 = arith.addf %134, %135 : vector<16x1xf32>
    %137 = math.rsqrt %136 : vector<16x1xf32>
    %138 = vector.broadcast %137 : vector<16x1xf32> to vector<16x64xf32>
    %139 = arith.mulf %128, %138 : vector<16x64xf32>
    %140 = vector.broadcast %129 : vector<1x64xf32> to vector<16x64xf32>
    %141 = arith.mulf %139, %140 : vector<16x64xf32>
    %142 = arith.truncf %141 : vector<16x64xf32> to vector<16x64xbf16>
    %c0_45 = arith.constant 0 : index
    %c0_46 = arith.constant 0 : index
    %143 = vector.load %arg6[%c0_45, %c0_46] : memref<64x384xbf16, #tpu.memory_space<vmem>>, vector<64x384xbf16>
    %cst_47 = arith.constant dense<0.000000e+00> : vector<16x384xf32>
    %144 = tpu.matmul %142, %143, %cst_47 {dimension_numbers = #tpu.dot_dimension_numbers<[1], [0], [0], [1], [0, 0, 1, 1], [], []>} : vector<16x64xbf16>, vector<64x384xbf16>, vector<16x384xf32> -> vector<16x384xf32>
    %145 = vector.extract_strided_slice %144 {offsets = [0, 0], sizes = [16, 192], strides = [1, 1]} : vector<16x384xf32> to vector<16x192xf32>
    %146 = vector.extract_strided_slice %144 {offsets = [0, 192], sizes = [16, 192], strides = [1, 1]} : vector<16x384xf32> to vector<16x192xf32>
    %147 = arith.negf %145 : vector<16x192xf32>
    %148 = math.exp %147 : vector<16x192xf32>
    %cst_48 = arith.constant 1.000000e+00 : f32
    %149 = vector.broadcast %cst_48 : f32 to vector<16x192xf32>
    %150 = arith.addf %149, %148 : vector<16x192xf32>
    %151 = arith.divf %149, %150 : vector<16x192xf32>
    %152 = arith.mulf %145, %151 : vector<16x192xf32>
    %153 = arith.mulf %152, %146 : vector<16x192xf32>
    %154 = arith.truncf %153 : vector<16x192xf32> to vector<16x192xbf16>
    %c0_49 = arith.constant 0 : index
    %c0_50 = arith.constant 0 : index
    %155 = vector.load %arg7[%c0_49, %c0_50] : memref<192x64xbf16, #tpu.memory_space<vmem>>, vector<192x64xbf16>
    %cst_51 = arith.constant dense<0.000000e+00> : vector<16x64xf32>
    %156 = tpu.matmul %154, %155, %cst_51 {dimension_numbers = #tpu.dot_dimension_numbers<[1], [0], [0], [1], [0, 0, 1, 1], [], []>} : vector<16x192xbf16>, vector<192x64xbf16>, vector<16x64xf32> -> vector<16x64xf32>
    %157 = arith.addf %128, %156 : vector<16x64xf32>
    %c0_52 = arith.constant 0 : index
    %c0_53 = arith.constant 0 : index
    %c0_54 = arith.constant 0 : index
    %158 = vector.load %arg12[%c0_52, %c0_53, %c0_54] : memref<1x16x64xf32, #tpu.memory_space<vmem>>, vector<1x16x64xf32>
    %159 = vector.shape_cast %158 : vector<1x16x64xf32> to vector<16x64xf32>
    %160 = vector.shape_cast %157 : vector<16x64xf32> to vector<1x16x64xf32>
    tpu.vector_store %arg12[%c0_52, %c0_53, %c0_54], %160 {strides = array<i32>} : memref<1x16x64xf32, #tpu.memory_space<vmem>>, vector<1x16x64xf32>,
    return
  }
  func.func @transform_0(%arg0: i32) -> (i32, i32, i32) {
    %c0_i32 = arith.constant 0 : i32
    %c0_i32_0 = arith.constant 0 : i32
    %c0_i32_1 = arith.constant 0 : i32
    return %arg0, %c0_i32, %c0_i32_0 : i32, i32, i32
  }
  func.func @transform_1(%arg0: i32) -> (i32, i32) {
    %c0_i32 = arith.constant 0 : i32
    %c0_i32_0 = arith.constant 0 : i32
    %c0_i32_1 = arith.constant 0 : i32
    return %c0_i32, %c0_i32_0 : i32, i32
  }
  func.func @transform_2(%arg0: i32) -> (i32, i32) {
    %c0_i32 = arith.constant 0 : i32
    %c0_i32_0 = arith.constant 0 : i32
    %c0_i32_1 = arith.constant 0 : i32
    return %c0_i32, %c0_i32_0 : i32, i32
  }
  func.func @transform_3(%arg0: i32) -> (i32, i32) {
    %c0_i32 = arith.constant 0 : i32
    %c0_i32_0 = arith.constant 0 : i32
    %c0_i32_1 = arith.constant 0 : i32
    return %c0_i32, %c0_i32_0 : i32, i32
  }
  func.func @transform_4(%arg0: i32) -> (i32, i32) {
    %c0_i32 = arith.constant 0 : i32
    %c0_i32_0 = arith.constant 0 : i32
    %c0_i32_1 = arith.constant 0 : i32
    return %c0_i32, %c0_i32_0 : i32, i32
  }
  func.func @transform_5(%arg0: i32) -> (i32, i32) {
    %c0_i32 = arith.constant 0 : i32
    %c0_i32_0 = arith.constant 0 : i32
    %c0_i32_1 = arith.constant 0 : i32
    return %c0_i32, %c0_i32_0 : i32, i32
  }
  func.func @transform_6(%arg0: i32) -> (i32, i32) {
    %c0_i32 = arith.constant 0 : i32
    %c0_i32_0 = arith.constant 0 : i32
    %c0_i32_1 = arith.constant 0 : i32
    return %c0_i32, %c0_i32_0 : i32, i32
  }
  func.func @transform_7(%arg0: i32) -> (i32, i32) {
    %c0_i32 = arith.constant 0 : i32
    %c0_i32_0 = arith.constant 0 : i32
    %c0_i32_1 = arith.constant 0 : i32
    return %c0_i32, %c0_i32_0 : i32, i32
  }
  func.func @transform_8(%arg0: i32) -> (i32, i32) {
    %c0_i32 = arith.constant 0 : i32
    %c0_i32_0 = arith.constant 0 : i32
    %c0_i32_1 = arith.constant 0 : i32
    return %c0_i32, %c0_i32_0 : i32, i32
  }
  func.func @transform_9(%arg0: i32) -> (i32, i32, i32) {
    %c0_i32 = arith.constant 0 : i32
    %c0_i32_0 = arith.constant 0 : i32
    %c0_i32_1 = arith.constant 0 : i32
    return %arg0, %c0_i32, %c0_i32_0 : i32, i32, i32
  }
  func.func @transform_10(%arg0: i32) -> (i32, i32, i32) {
    %c0_i32 = arith.constant 0 : i32
    %c0_i32_0 = arith.constant 0 : i32
    %c0_i32_1 = arith.constant 0 : i32
    return %arg0, %c0_i32, %c0_i32_0 : i32, i32, i32
  }
  func.func @transform_11(%arg0: i32) -> (i32, i32, i32) {
    %c0_i32 = arith.constant 0 : i32
    %c0_i32_0 = arith.constant 0 : i32
    %c0_i32_1 = arith.constant 0 : i32
    return %arg0, %c0_i32, %c0_i32_0 : i32, i32, i32
  }
  func.func @transform_12(%arg0: i32) -> (i32, i32, i32) {
    %c0_i32 = arith.constant 0 : i32
    %c0_i32_0 = arith.constant 0 : i32
    %c0_i32_1 = arith.constant 0 : i32
    return %arg0, %c0_i32, %c0_i32_0 : i32, i32, i32
  }
  func.func @transform_13(%arg0: i32) -> (i32, i32, i32) {
    %c0_i32 = arith.constant 0 : i32
    %c0_i32_0 = arith.constant 0 : i32
    %c0_i32_1 = arith.constant 0 : i32
    return %arg0, %c0_i32, %c0_i32_0 : i32, i32, i32
  }
}

</mosaic_0001>

<bundles_post_ra>
// kernel: tile.23
= control target key start
LH: loop header
LB: loop body
LE: loop exit
PB: predicated region body
PF: predicated region fallthrough
CT: control target
= control target key end

     0   :  { %vm83_vm0 = vcmask 1047556   ;;  %vm85_vm1 = vcmask 130048   ;;  %vm104_vm2 = vcmask 261248   ;;  %s226_s0 = inlined_call_operand.vmem [shape: f32[16,2,16], index: 0, kind: input, shape index: {}]   ;;  %s227_s1 = inlined_call_operand.vmem [shape: f32[16,32], index: 1, kind: output, shape index: {}]  }
   0x1   :  { %v139_v0 = vld [vmem:[%s226_s0 + $0xe] sm:$0x3]  ;;  %v140_v1 = vld [vmem:[%s226_s0 + $0xc] sm:$0x3]  ;;  %v141_v2 = vld [vmem:[%s226_s0 + $0xa] sm:$0x3] }
   0x2   :  { %49 = vst [vmem:[#allocation0 + $0x38] sm:$0x3] %v139_v0  ;;  %54 = vst [vmem:[#allocation0 + $0x30] sm:$0x3] %v140_v1  ;;  %v142_v3 = vld [vmem:[%s226_s0 + $0x8] sm:$0x3] }
   0x3   :  { %59 = vst [vmem:[#allocation0 + $0x28] sm:$0x3] %v141_v2  ;;  %v143_v4 = vld [vmem:[%s226_s0 + $0x6] sm:$0x3]  ;;  %v144_v5 = vld [vmem:[%s226_s0 + $0x4] sm:$0x3] }
   0x4   :  { %64 = vst [vmem:[#allocation0 + $0x20] sm:$0x3] %v142_v3  ;;  %69 = vst [vmem:[#allocation0 + $0x18] sm:$0x3] %v143_v4  ;;  %v145_v6 = vld [vmem:[%s226_s0 + $0x2] sm:$0x3] }
   0x5   :  { %74 = vst [vmem:[#allocation0 + $0x10] sm:$0x3] %v144_v5  ;;  %v79_v7 = vld [vmem:[%s226_s0] sm:$0x3]  ;;  %78 = vst [vmem:[#allocation0 + $0x8] sm:$0x3] %v145_v6 }
   0x6   :  { %80 = vst [vmem:[#allocation0] sm:$0x3] %v79_v7  ;;  %v131_v8 = vld [vmem:[%s226_s0 + $0x1e] sm:$0x3]  ;;  %v132_v9 = vld [vmem:[%s226_s0 + $0x1c] sm:$0x3] }
   0x7   :  { %v133_v10 = vld [vmem:[%s226_s0 + $0x1a] sm:$0x3]  ;;  %9 = vst [vmem:[#allocation0 + $0x78] sm:$0x3] %v131_v8  ;;  %14 = vst [vmem:[#allocation0 + $0x70] sm:$0x3] %v132_v9 }
   0x8   :  { %19 = vst [vmem:[#allocation0 + $0x68] sm:$0x3] %v133_v10  ;;  %v134_v11 = vld [vmem:[%s226_s0 + $0x18] sm:$0x3]  ;;  %v135_v12 = vld [vmem:[%s226_s0 + $0x16] sm:$0x3] }
   0x9   :  { %v136_v13 = vld [vmem:[%s226_s0 + $0x14] sm:$0x3]  ;;  %24 = vst [vmem:[#allocation0 + $0x60] sm:$0x3] %v134_v11  ;;  %29 = vst [vmem:[#allocation0 + $0x58] sm:$0x3] %v135_v12 }
   0xa   :  { %34 = vst [vmem:[#allocation0 + $0x50] sm:$0x3] %v136_v13  ;;  %v137_v14 = vld [vmem:[%s226_s0 + $0x12] sm:$0x3]  ;;  %v138_v15 = vld [vmem:[%s226_s0 + $0x10] sm:$0x3] }
   0xb   :  { %39 = vst [vmem:[#allocation0 + $0x48] sm:$0x3] %v137_v14  ;;  %44 = vst [vmem:[#allocation0 + $0x40] sm:$0x3] %v138_v15  ;;  %s149_s0 = smov 16  }
   0xc   :  { %v99_v16 = vld [vmem:[#allocation0 + $0x1] ss:$8 sm:$0xf0]   ;;  %v82_v17 = vld [vmem:[#allocation0] ss:$8 sm:$0xf0]  }
   0xd   :  { %v97_v18 = vld [vmem:[#allocation0 + $0x1] ss:$8 sm:$0xf]   ;;  %v81_v19 = vld [vmem:[#allocation0] ss:$8 sm:$0xf]  }
   0xe   :  { %v101_v20 = vsel %vm83_vm0, %v99_v16, %v97_v18  ;;  %v84_v21 = vsel %vm83_vm0, %v82_v17, %v81_v19 }
   0xf   :  { %102 = vrot.lane.b32.xlu0 %v101_v20, %s149_s0  ;;  %86 = vst.msk [vmem:[%s227_s1] sm:$0xff] %vm85_vm1, %v84_v21  }
  0x10   :  { %v109_v22 = vld [vmem:[#allocation0 + $0x41] ss:$8 sm:$0xf0]   ;;  %v90_v23 = vld [vmem:[#allocation0 + $0x40] ss:$8 sm:$0xf0]  }
  0x12   :  { %v107_v24 = vld [vmem:[#allocation0 + $0x41] ss:$8 sm:$0xf]   ;;  %v88_v25 = vld [vmem:[#allocation0 + $0x40] ss:$8 sm:$0xf]  }
  0x13   :  { %v111_v26 = vsel %vm83_vm0, %v109_v22, %v107_v24  ;;  %v92_v27 = vsel %vm83_vm0, %v90_v23, %v88_v25 }
  0x14   :  { %146 = vst.msk [vmem:[%s227_s1 + $0x8] sm:$0xff] %vm85_vm1, %v92_v27   ;;  %112 = vrot.lane.b32.xlu0 %v111_v26, %s149_s0 }
  0x81   :  { %v103_v28 = vpop.permute.xlu0 %102  }
  0x82   :  { %105 = vst.msk [vmem:[%s227_s1] sm:$0xff] %vm104_vm2, %v103_v28  }
  0x86   :  { %v113_v29 = vpop.permute.xlu0 %112  }
  0x87   :  { %147 = vst.msk [vmem:[%s227_s1 + $0x8] sm:$0xff] %vm104_vm2, %v113_v29  }

// kernel: tile.19
= control target key start
LH: loop header
LB: loop body
LE: loop exit
PB: predicated region body
PF: predicated region fallthrough
CT: control target
= control target key end

     0   :  { %vm83_vm0 = vcmask 1047556   ;;  %vm85_vm1 = vcmask 130048   ;;  %s196_s9 = smov 48   ;;  %s197_s14 = smov 16   ;;  %vm104_vm2 = vcmask 523648   ;;  %vm125_vm3 = vcmask 392448   ;;  %s290_s0 = inlined_call_operand.vmem [shape: f32[16,4,16], index: 0, kind: input, shape index: {}]   ;;  %s291_s1 = inlined_call_operand.vmem [shape: f32[16,64], index: 1, kind: output, shape index: {}]  }
   0x1   :  { %v181_v0 = vld [vmem:[%s290_s0 + $0x1c] sm:$0xf]  ;;  %v182_v1 = vld [vmem:[%s290_s0 + $0x18] sm:$0xf]  ;;  %v183_v2 = vld [vmem:[%s290_s0 + $0x14] sm:$0xf] }
   0x2   :  { %49 = vst [vmem:[#allocation0 + $0x38] sm:$0xf] %v181_v0  ;;  %54 = vst [vmem:[#allocation0 + $0x30] sm:$0xf] %v182_v1  ;;  %v184_v3 = vld [vmem:[%s290_s0 + $0x10] sm:$0xf] }
   0x3   :  { %59 = vst [vmem:[#allocation0 + $0x28] sm:$0xf] %v183_v2  ;;  %v185_v4 = vld [vmem:[%s290_s0 + $0xc] sm:$0xf]  ;;  %v186_v5 = vld [vmem:[%s290_s0 + $0x8] sm:$0xf] }
   0x4   :  { %64 = vst [vmem:[#allocation0 + $0x20] sm:$0xf] %v184_v3  ;;  %69 = vst [vmem:[#allocation0 + $0x18] sm:$0xf] %v185_v4  ;;  %v187_v6 = vld [vmem:[%s290_s0 + $0x4] sm:$0xf] }
   0x5   :  { %74 = vst [vmem:[#allocation0 + $0x10] sm:$0xf] %v186_v5  ;;  %v79_v7 = vld [vmem:[%s290_s0] sm:$0xf]  ;;  %78 = vst [vmem:[#allocation0 + $0x8] sm:$0xf] %v187_v6 }
   0x6   :  { %80 = vst [vmem:[#allocation0] sm:$0xf] %v79_v7  ;;  %v173_v8 = vld [vmem:[%s290_s0 + $0x3c] sm:$0xf]  ;;  %v174_v9 = vld [vmem:[%s290_s0 + $0x38] sm:$0xf] }
   0x7   :  { %9 = vst [vmem:[#allocation0 + $0x78] sm:$0xf] %v173_v8  ;;  %14 = vst [vmem:[#allocation0 + $0x70] sm:$0xf] %v174_v9  ;;  %v175_v10 = vld [vmem:[%s290_s0 + $0x34] sm:$0xf] }
   0x8   :  { %v176_v11 = vld [vmem:[%s290_s0 + $0x30] sm:$0xf]  ;;  %v177_v12 = vld [vmem:[%s290_s0 + $0x2c] sm:$0xf]  ;;  %19 = vst [vmem:[#allocation0 + $0x68] sm:$0xf] %v175_v10 }
   0x9   :  { %24 = vst [vmem:[#allocation0 + $0x60] sm:$0xf] %v176_v11  ;;  %29 = vst [vmem:[#allocation0 + $0x58] sm:$0xf] %v177_v12  ;;  %v178_v13 = vld [vmem:[%s290_s0 + $0x28] sm:$0xf] }
   0xa   :  { %v179_v14 = vld [vmem:[%s290_s0 + $0x24] sm:$0xf]  ;;  %v180_v15 = vld [vmem:[%s290_s0 + $0x20] sm:$0xf]  ;;  %34 = vst [vmem:[#allocation0 + $0x50] sm:$0xf] %v178_v13 }
   0xb   :  { %39 = vst [vmem:[#allocation0 + $0x48] sm:$0xf] %v179_v14  ;;  %44 = vst [vmem:[#allocation0 + $0x40] sm:$0xf] %v180_v15  ;;  %s195_s0 = smov 32   ;;  %vm146_vm4 = vcmask 261248  }
   0xc   :  { %v120_v16 = vld [vmem:[#allocation0 + $0x2] ss:$8 sm:$0xf0]   ;;  %v99_v17 = vld [vmem:[#allocation0 + $0x3] ss:$8 sm:$0xf0]  }
   0xd   :  { %v118_v18 = vld [vmem:[#allocation0 + $0x2] ss:$8 sm:$0xf]   ;;  %v97_v19 = vld [vmem:[#allocation0 + $0x3] ss:$8 sm:$0xf]  }
   0xe   :  { %v122_v20 = vsel %vm83_vm0, %v120_v16, %v118_v18  ;;  %v101_v21 = vsel %vm83_vm0, %v99_v17, %v97_v19  ;;  %v139_v24 = vld [vmem:[#allocation0 + $0x1] ss:$8 sm:$0xf]   ;;  %v81_v32 = vld [vmem:[#allocation0] ss:$8 sm:$0xf]  }
   0xf   :  { %123 = vrot.lane.b32.xlu1 %v122_v20, %s195_s0  ;;  %102 = vrot.lane.b32.xlu0 %v101_v21, %s196_s9  ;;  %v141_v25 = vld [vmem:[#allocation0 + $0x1] ss:$8 sm:$0xf0]   ;;  %v82_v33 = vld [vmem:[#allocation0] ss:$8 sm:$0xf0]  }
  0x10   :  { %v130_v22 = vld [vmem:[#allocation0 + $0x42] ss:$8 sm:$0xf0]   ;;  %v109_v23 = vld [vmem:[#allocation0 + $0x43] ss:$8 sm:$0xf0]   ;;  %v84_v34 = vsel %vm83_vm0, %v82_v33, %v81_v32  ;;  %v143_v38 = vsel %vm83_vm0, %v141_v25, %v139_v24 }
  0x11   :  { %v151_v31 = vld [vmem:[#allocation0 + $0x41] ss:$8 sm:$0xf0]   ;;  %v90_v36 = vld [vmem:[#allocation0 + $0x40] ss:$8 sm:$0xf0]  }
  0x12   :  { %v128_v26 = vld [vmem:[#allocation0 + $0x42] ss:$8 sm:$0xf]   ;;  %v107_v27 = vld [vmem:[#allocation0 + $0x43] ss:$8 sm:$0xf]  }
  0x13   :  { %v132_v28 = vsel %vm83_vm0, %v130_v22, %v128_v26  ;;  %v111_v29 = vsel %vm83_vm0, %v109_v23, %v107_v27  ;;  %v149_v30 = vld [vmem:[#allocation0 + $0x41] ss:$8 sm:$0xf]   ;;  %v88_v35 = vld [vmem:[#allocation0 + $0x40] ss:$8 sm:$0xf]  }
  0x14   :  { %133 = vrot.lane.b32.xlu1 %v132_v28, %s195_s0  ;;  %112 = vrot.lane.b32.xlu0 %v111_v29, %s196_s9  ;;  %v153_v37 = vsel %vm83_vm0, %v151_v31, %v149_v30  ;;  %86 = vst.msk [vmem:[%s291_s1] sm:$0xff] %vm85_vm1, %v84_v34   ;;  %v92_v39 = vsel %vm83_vm0, %v90_v36, %v88_v35 }
  0x15   :  { %188 = vst.msk [vmem:[%s291_s1 + $0x8] sm:$0xff] %vm85_vm1, %v92_v39  }
  0x18   :  { %154 = vrot.lane.b32.xlu1 %v153_v37, %s197_s14  ;;  %144 = vrot.lane.b32.xlu0 %v143_v38, %s197_s14 }
  0x81   :  { %v124_v40 = vpop.permute.xlu1 %123   ;;  %v103_v41 = vpop.permute.xlu0 %102  }
  0x82   :  { %105 = vst.msk [vmem:[%s291_s1] sm:$0xff] %vm104_vm2, %v103_v41  }
  0x83   :  { %126 = vst.msk [vmem:[%s291_s1] sm:$0xff] %vm125_vm3, %v124_v40  }
  0x86   :  { %v134_v42 = vpop.permute.xlu1 %133   ;;  %v113_v43 = vpop.permute.xlu0 %112  }
  0x87   :  { %189 = vst.msk [vmem:[%s291_s1 + $0x8] sm:$0xff] %vm104_vm2, %v113_v43  }
  0x88   :  { %190 = vst.msk [vmem:[%s291_s1 + $0x8] sm:$0xff] %vm125_vm3, %v134_v42  }
  0x8a   :  { %v155_v44 = vpop.permute.xlu1 %154   ;;  %v145_v45 = vpop.permute.xlu0 %144  }
  0x8b   :  { %191 = vst.msk [vmem:[%s291_s1 + $0x8] sm:$0xff] %vm146_vm4, %v155_v44   ;;  %147 = vst.msk [vmem:[%s291_s1] sm:$0xff] %vm146_vm4, %v145_v45  }

// kernel: transformer_block_forward.1
= control target key start
LH: loop header
LB: loop body
LE: loop exit
PB: predicated region body
PF: predicated region fallthrough
CT: control target
= control target key end

     0   :  { %s2572_s0 = inlined_call_operand.vmem [shape: f32[2,16,64], index: 0, kind: input, shape index: {}]   ;;  %s2573_s1 = inlined_call_operand.vmem [shape: f32[1,64], index: 1, kind: input, shape index: {}]   ;;  %s2574_s2 = inlined_call_operand.vmem [shape: f32[1,64], index: 2, kind: input, shape index: {}]   ;;  %s2575_s3 = inlined_call_operand.vmem [shape: bf16[64,128], index: 3, kind: input, shape index: {}]   ;;  %s2576_s4 = inlined_call_operand.vmem [shape: bf16[64,64], index: 4, kind: input, shape index: {}]   ;;  %s2577_s5 = inlined_call_operand.vmem [shape: bf16[64,384], index: 5, kind: input, shape index: {}]   ;;  %s2578_s6 = inlined_call_operand.vmem [shape: bf16[192,64], index: 6, kind: input, shape index: {}]   ;;  %s2579_s7 = inlined_call_operand.vmem [shape: f32[16,128], index: 7, kind: input, shape index: {}]   ;;  %s2580_s8 = inlined_call_operand.vmem [shape: f32[16,128], index: 8, kind: input, shape index: {}]   ;;  %s2581_s9 = inlined_call_operand.vmem [shape: bf16[2,32,32], index: 9, kind: input, shape index: {}, may-alias: {9,12}]   ;;  %s2582_s10 = inlined_call_operand.vmem [shape: bf16[2,32,32], index: 10, kind: input, shape index: {}, may-alias: {10,13}]   ;;  %s2583_s11 = inlined_call_operand.hbm [shape: f32[2,16,64], index: 11, kind: output, shape index: {0}]   ;;  %s2584_s12 = inlined_call_operand.vmem [shape: bf16[2,32,32], index: 12, kind: output, shape index: {1}, may-alias: {9,12}]   ;;  %s2585_s13 = inlined_call_operand.vmem [shape: bf16[2,32,32], index: 13, kind: output, shape index: {2}, may-alias: {10,13}]  }
   0x1   :  { %2590 = sst [smem:[#allocation5_spill]] %s2572_s0 }
   0x2   :  { %19 = vsyncpa [#allocation3], 0 }
   0x3   :  { %21 = vsyncpa [#allocation3 + $0x1], 0  ;;  %s2204_s25 = smov 0   ;;  %s2206_s26 = smov 0  }
   0x4   :  { %s2208_s27 = smov 0   ;;  %s2210_s9 = smov 0  }
   0x5 LB: > { %s2225_s10 = sadd.s32 4294967295, %s2117_s9   ;;  %s1733_s28 = sadd.s32 4294967294, %s2117_s9   ;;  %s2117_s9 = sphi %s2210_s9, %s2599_s9   ;;  %s2113_s27 = sphi %s2208_s27, %s2598_s27   ;;  %s2109_s26 = sphi %s2206_s26, %s2597_s26   ;;  %s2105_s25 = sphi %s2204_s25, %s2596_s25  }
   0x6   : > { %s2229_s29 = sadd.s32 1, %s2117_s9   ;;  %s280_s30 = sadd.s32 1, %s2113_s27 }
   0x7   : > { %s277_s14 = ssub.s32 %s2117_s9, %s2229_s29  ;;  %p290_p0 = scmp.ne.s32.totalorder %s2113_s27, %s2109_s26 }
   0x8   : > { %p278_p1 = scmp.eq.s32.totalorder %s277_s14, 0  ;;  %p291_p2 = scmp.eq.s32.totalorder %s2225_s10, 1 }
   0x9   : > { %p296_p3 = scmp.ne.s32.totalorder %s2109_s26, %s2105_s25  ;;  %p297_p4 = scmp.eq.s32.totalorder %s1733_s28, 1 }
   0xa   : > { %s2240_s15 = scalar_select %p278_p1, %s2113_s27, %s280_s30  }
   0xb   : > { %p2242_p5 = por %p291_p2, %p290_p0  ;;  %p2246_p6 = por %p297_p4, %p296_p3 }
   0xc   : > { %p1736_p7 = scmp.ge.s32.totalorder %s2117_s9, 1  ;;  %p415_p8 = scmp.lt.s32.totalorder %s2117_s9, 3 }
   0xe   : > { %p416_p9 = pnand %p1736_p7, %p415_p8 }
   0xf   : > { %p479_p10 = scmp.lt.s32.totalorder (!%p416_p9), %s2225_s10, 1  ;;  %s2593_s0 = sld [smem:[#allocation5_spill]] (!%p416_p9) }
  0x10   : > { %419 = sbr.rel (%p416_p9) target bundleno = 2521 (0x9d9), region = 64  ;;  %s2121_s24 = smov (!%p416_p9), 1  }
  0x11   : > { %s2122_s28 = smov (!%p416_p9), 127   ;;  %s2588_s30 = smov (!%p416_p9), 64  }
  0x12   : > { %s2125_s14 = smov (!%p416_p9), 96   ;;  %s2128_s21 = smov (!%p416_p9), 16  }
  0x15   : > { %s480_s18 = scalar_select %p479_p10, %s2225_s10, 1  ;;  %vm510_vm0 = vcmask 523264   ;;  %v1965_v6 = vld [vmem:[%s2575_s3 + $0x18] sm:$0xff]   ;;  %v2119_v7 = vmov 0.0   ;;  %vm2120_vm1 = vmmov 0   ;;  %v1966_v8 = vld [vmem:[%s2575_s3 + $0x10] sm:$0xff]   ;;  %v611_v29 = vlaneseq }
  0x16   : > { %1835 = vmatprep.subr.bf16.mxu0 %v2119_v7  ;;  %1843 = vmatprep.mubr.msk.bf16.mxu0 %vm2120_vm1, %v2119_v7  ;;  %v1967_v9 = vld [vmem:[%s2575_s3 + $0x8] sm:$0xff]   ;;  %v1968_v10 = vld [vmem:[%s2575_s3] sm:$0xff]   ;;  %vm740_vm3 = vcmask 130048   ;;  %v2126_v63 = vmov -1e+30   ;;  %vm1093_vm8 = vcmask 261120  }
  0x17   : > { %s2254_s19 = sshll.u32 %s480_s18, 4  ;;  %1836 = vmatpush3.bf16.msra.mxu0 %v1965_v6  ;;  %v1744_v20 = vld [vmem:[%s2573_s1] ss:$0 sm:$0xff]  ;;  %v2294_v30 = vand.u32 127, %v611_v29  ;;  %v639_v39 = vld [vmem:[%s2579_s7 + $0x8] sm:$0xff]  ;;  %v678_v58 = vshrl.u32 %v611_v29, 7 }
  0x18   : > { %s483_s22 = scalar_lea.vmem %s2593_s0, %s2254_s19  ;;  %1837 = vmatprep.subr.bf16.mxu0 %v2119_v7  ;;  %v642_v37 = vld [vmem:[%s2580_s8] sm:$0xff]  ;;  %v643_v41 = vld [vmem:[%s2580_s8 + $0x8] sm:$0xff]  ;;  %s2586_s18 = smov 32   ;;  %vm1096_vm9 = vcmask 392192   ;;  %vm660_vm10 = vcmask 257024  }
  0x19   : > { %v2260_v0 = vld [vmem:[%s483_s22] sm:$0xff]  ;;  %v2262_v1 = vld [vmem:[%s483_s22 + $0x8] sm:$0xff]  ;;  %v617_v31 = vand.u32 1, %v2294_v30  ;;  %v686_v59 = vand.u32 15, %v678_v58  ;;  %v679_v60 = vadd.s32 8, %v678_v58  ;;  %s2129_s22 = smov 48   ;;  %s498_s20 = scalar_lea.vmem %s2584_s12, %s2254_s19 }
  0x1a   : > { %v508_v2 = vmul.f32 %v2260_v0, %v2260_v0  ;;  %v509_v3 = vmul.f32 %v2262_v1, %v2262_v1  ;;  %v638_v38 = vld [vmem:[%s2579_s7] sm:$0xff]  ;;  %s2594_s0 = smov 64  }
  0x1b   : > { %1838 = vmatpush3.bf16.msra.mxu0 %v1966_v8  ;;  %vm633_vm2 = vcmp.eq.s32.totalorder %v617_v31, 0  ;;  %vm730_vm4 = vcmp.le.s32.totalorder %v2294_v30, %v686_v59  ;;  %v693_v61 = vand.u32 15, %v679_v60 }
  0x1c   : > { %v511_v4 = vsel %vm510_vm0, %v508_v2, 0.0  ;;  %v514_v5 = vsel %vm510_vm0, %v509_v3, 0.0  ;;  %1839 = vmatprep.subr.bf16.mxu0 %v2119_v7  ;;  %v734_v2 = vsel %vm730_vm4, 0.0, %v2126_v63 }
  0x1d   : > { %512 = vadd.xlane.f32.xlu0 %v511_v4  ;;  %vm731_vm5 = vcmp.le.s32.totalorder %v2294_v30, %v693_v61 }
  0x1e   : > { %v735_v6 = vsel %vm731_vm5, 0.0, %v2126_v63 }
  0x1f   : > { %1840 = vmatpush3.bf16.msra.mxu0 %v1967_v9 }
  0x20   : > { %1841 = vmatprep.subr.bf16.mxu0 %v2119_v7 }
  0x21   : > { %515 = vadd.xlane.f32.xlu0 %v514_v5 }
  0x23   : > { %1842 = vmatpush3.bf16.msra.mxu0 %v1968_v10 }
  0xa6   : > { %v513_v11 = vpop.xlane.xlu0 %512 }
  0xa7   : > { %v518_v12 = vmul.f32 0.015625, %v513_v11 }
  0xa9   : > { %v520_v13 = vadd.f32 1e-05, %v518_v12  ;;  %v680_v12 = vadd.s32 16, %v678_v58 }
  0xaa   : > { %v516_v14 = vpop.xlane.xlu0 %515 }
  0xab   : > { %2001 = vrsqrt.f32 %v520_v13  ;;  %v519_v15 = vmul.f32 0.015625, %v516_v14  ;;  %v700_v13 = vand.u32 15, %v680_v12  ;;  %v681_v14 = vadd.s32 24, %v678_v58 }
  0xad   : > { %v521_v16 = vadd.f32 1e-05, %v519_v15  ;;  %vm732_vm6 = vcmp.le.s32.totalorder %v2294_v30, %v700_v13  ;;  %v707_v15 = vand.u32 15, %v681_v14 }
  0xaf   : > { %2003 = vrsqrt.f32 %v521_v16  ;;  %v736_v16 = vsel %vm732_vm6, 0.0, %v2126_v63  ;;  %vm733_vm7 = vcmp.le.s32.totalorder %v2294_v30, %v707_v15 }
  0xb8   : > { %v2002_v17 = vpop.eup %2001 }
  0xb9   : > { %v524_v18 = vmul.f32 %v2002_v17, %v2260_v0 }
  0xbb   : > { %v532_v22 = vmul.f32 %v1744_v20, %v524_v18 }
  0xbc   : > { %v2004_v19 = vpop.eup %2003 }
  0xbd   : > { %v525_v21 = vmul.f32 %v2004_v19, %v2262_v1 }
  0xbf   : > { %v533_v23 = vmul.f32 %v1744_v20, %v525_v21 }
  0xc1   : > { %v534_v24 = vpack.c.bf16 %v533_v23, %v532_v22  ;;  %v737_v22 = vsel %vm733_vm7, 0.0, %v2126_v63 }
  0xc3   : > { %1844 = vmatmul.mubr.msk.bf16.vlgmr.msra.gmra.mxu0 %vm510_vm0, %v534_v24 }
 0x183   : > { %v604_v25 = vpop.f32.mrf.mxu0 }
 0x184   : > { %625 = vrot.lane.b32.xlu0 %v604_v25, %s2121_s24  ;;  %629 = vrot.lane.b32.xlu1 %v604_v25, %s2122_s28  ;;  %v640_v45 = vmul.f32 %v638_v38, %v604_v25 }
 0x185   : > { %v1845_v26 = vpop.f32.mrf.mxu0 }
 0x187   : > { %v607_v27 = vpop.f32.mrf.mxu0 }
 0x188   : > { %631 = vrot.lane.b32.xlu1 %v607_v27, %s2122_s28  ;;  %v641_v46 = vmul.f32 %v639_v39, %v607_v27  ;;  %s2123_s28 = smov 112  }
 0x189   : > { %v1846_v28 = vpop.f32.mrf.mxu0 }
 0x18c   : > { %627 = vrot.lane.b32.xlu1 %v607_v27, %s2121_s24  ;;  %s2595_s24 = smov 32  }
 0x1f6   : > { %v630_v32 = vpop.permute.xlu1 %629  ;;  %v626_v34 = vpop.permute.xlu0 %625 }
 0x1f7   : > { %v634_v33 = vsub.f32 0.0, %v630_v32 }
 0x1f9   : > { %v636_v36 = vsel %vm633_vm2, %v634_v33, %v626_v34 }
 0x1fa   : > { %v632_v35 = vpop.permute.xlu1 %631  ;;  %v644_v42 = vmul.f32 %v642_v37, %v636_v36 }
 0x1fb   : > { %v635_v40 = vsub.f32 0.0, %v632_v35 }
 0x1fc   : > { %v2309_v48 = vadd.f32 %v644_v42, %v640_v45 }
 0x1fe   : > { %v628_v43 = vpop.permute.xlu1 %627 }
 0x1ff   : > { %v637_v44 = vsel %vm633_vm2, %v635_v40, %v628_v43 }
 0x200   : > { %v645_v47 = vmul.f32 %v643_v41, %v637_v44 }
 0x202   : > { %v2311_v49 = vadd.f32 %v645_v47, %v641_v46 }
 0x204   : > { %v2315_v50 = vpack.c.bf16 %v2311_v49, %v2309_v48 }
 0x206   : > { %671 = vrot.lane.b32.xlu1 %v2315_v50, %s2123_s28  ;;  %1849 = vmatprep.mubr.msk.bf16.mxu1 %vm740_vm3, %v2315_v50  ;;  %s1807_s28 = sshll.u32 %s2225_s10, 8 }
 0x20a   : > { %738 = vrot.lane.b32.xlu1 %v2315_v50, %s2588_s30 }
 0x278   : > { %v2322_v51 = vpop.permute.xlu1 %671 }
 0x279   : > { %799 = vrot.lane.b32.xlu1 %v2322_v51, %s2588_s30  ;;  %s503_s30 = scalar_lea.vmem %s2585_s13, %s2254_s19 }
 0x27c   : > { %v739_v52 = vpop.permute.xlu1 %738 }
 0x27d   : > { %673 = vrot.lane.b32.xlu1 %v2315_v50, %s2125_s14  ;;  %1895 = vmatprep.subr.msk.bf16.mxu1 %vm740_vm3, %v739_v52  ;;  %v748_v53 = vsel %vm740_vm3, %v739_v52, 0 }
 0x27e   : > { %1848 = vmatpush3.bf16.xpose.msra.mxu1 %v748_v53 }
 0x281   : > { %675 = vrot.lane.b32.xlu1 %v2322_v51, %s2125_s14 }
 0x285   : > { %1850 = vmatmul.mubr.msk.bf16.vlgmr.msra.gmra.mxu1 %vm740_vm3, %v2322_v51 }
 0x2eb   : > { %v800_v54 = vpop.permute.xlu1 %799 }
 0x2ec   : > { %v808_v55 = vsel %vm740_vm3, %v800_v54, 0  ;;  %1896 = vmatprep.subr.msk.bf16.mxu1 %vm740_vm3, %v800_v54 }
 0x2ed   : > { %1854 = vmatpush3.bf16.xpose.msra.mxu1 %v808_v55 }
 0x2ef   : > { %v674_v56 = vpop.permute.xlu1 %673 }
 0x2f0   : > { %1855 = vmatprep.mubr.msk.bf16.mxu1 %vm740_vm3, %v674_v56 }
 0x2f3   : > { %v676_v57 = vpop.permute.xlu1 %675 }
 0x2f4   : > { %1856 = vmatmul.mubr.msk.bf16.vlgmr.msra.gmra.mxu1 %vm740_vm3, %v676_v57 }
 0x345   : > { %v1851_v62 = vpop.f32.mrf.mxu1 }
 0x346   : > { %v793_v28 = vadd.f32 %v1851_v62, %v736_v16 }
 0x347   : > { %v784_v3 = vpop.f32.mrf.mxu1 }
 0x348   : > { %v785_v4 = vadd.f32 %v784_v3, %v734_v2  ;;  %v865_v32 = vsel %vm740_vm3, %v793_v28, -inf }
 0x349   : > { %v1852_v5 = vpop.f32.mrf.mxu1 }
 0x34a   : > { %v859_v8 = vsel %vm740_vm3, %v785_v4, -inf  ;;  %v796_v29 = vadd.f32 %v1852_v5, %v737_v22 }
 0x34b   : > { %v787_v9 = vpop.f32.mrf.mxu1  ;;  %860 = vmax.xlane.f32.xlu0 %v859_v8 }
 0x34c   : > { %v788_v10 = vadd.f32 %v787_v9, %v735_v6  ;;  %v868_v33 = vsel %vm740_vm3, %v796_v29, -inf }
 0x34e   : > { %v862_v11 = vsel %vm740_vm3, %v788_v10, -inf }
 0x34f   : > { %863 = vmax.xlane.f32.xlu0 %v862_v11 }
 0x3b4   : > { %v1857_v17 = vpop.f32.mrf.mxu1 }
 0x3b5   : > { %v853_v18 = vadd.f32 %v1857_v17, %v736_v16 }
 0x3b6   : > { %v844_v19 = vpop.f32.mrf.mxu1 }
 0x3b7   : > { %v845_v20 = vadd.f32 %v844_v19, %v734_v2  ;;  %v877_v21 = vsel %vm740_vm3, %v853_v18, -inf }
 0x3b8   : > { %878 = vmax.xlane.f32.xlu1 %v877_v21  ;;  %v1858_v23 = vpop.f32.mrf.mxu1 }
 0x3b9   : > { %v856_v24 = vadd.f32 %v1858_v23, %v737_v22  ;;  %v871_v25 = vsel %vm740_vm3, %v845_v20, -inf }
 0x3ba   : > { %v847_v26 = vpop.f32.mrf.mxu1  ;;  %872 = vmax.xlane.f32.xlu0 %v871_v25 }
 0x3bb   : > { %v848_v27 = vadd.f32 %v847_v26, %v735_v6  ;;  %v880_v30 = vsel %vm740_vm3, %v856_v24, -inf }
 0x3bd   : > { %v874_v31 = vsel %vm740_vm3, %v848_v27, -inf }
 0x3be   : > { %875 = vmax.xlane.f32.xlu1 %v874_v31  ;;  %881 = vmax.xlane.f32.xlu0 %v880_v30 }
 0x3c2   : > { %866 = vmax.xlane.f32.xlu1 %v865_v32  ;;  %869 = vmax.xlane.f32.xlu0 %v868_v33 }
 0x3d4   : > { %v861_v34 = vpop.xlane.xlu0 %860 }
 0x3d5   : > { %v883_v40 = vsub.f32 %v785_v4, %v861_v34 }
 0x3d7   : > { %v891_v46 = vmul.f32 1.442695, %v883_v40 }
 0x3d8   : > { %v864_v35 = vpop.xlane.xlu0 %863 }
 0x3d9   : > { %v884_v41 = vsub.f32 %v788_v10, %v864_v35 }
 0x3db   : > { %v893_v54 = vmul.f32 1.442695, %v884_v41 }
 0x441   : > { %v879_v36 = vpop.xlane.xlu1 %878 }
 0x442   : > { %v889_v47 = vsub.f32 %v853_v18, %v879_v36 }
 0x443   : > { %v873_v37 = vpop.xlane.xlu0 %872 }
 0x444   : > { %v903_v56 = vmul.f32 1.442695, %v889_v47  ;;  %v887_v57 = vsub.f32 %v845_v20, %v873_v37 }
 0x446   : > { %v899_v60 = vmul.f32 1.442695, %v887_v57 }
 0x447   : > { %v876_v38 = vpop.xlane.xlu1 %875  ;;  %v882_v39 = vpop.xlane.xlu0 %881 }
 0x448   : > { %v890_v55 = vsub.f32 %v856_v24, %v882_v39  ;;  %v888_v58 = vsub.f32 %v848_v27, %v876_v38 }
 0x44a   : > { %v905_v59 = vmul.f32 1.442695, %v890_v55  ;;  %v901_v61 = vmul.f32 1.442695, %v888_v58 }
 0x44b   : > { %v867_v42 = vpop.xlane.xlu1 %866  ;;  %v870_v43 = vpop.xlane.xlu0 %869 }
 0x44c   : > { %v885_v44 = vsub.f32 %v793_v28, %v867_v42  ;;  %v886_v45 = vsub.f32 %v796_v29, %v870_v43 }
 0x44e   : > { %v895_v52 = vmul.f32 1.442695, %v885_v44  ;;  %v897_v53 = vmul.f32 1.442695, %v886_v45  ;;  %v1969_v45 = vld [vmem:[%s2576_s4 + $0x18] sm:$0xff]  }
 0x450   : > { %2005 = vpow2.f32 %v895_v52  ;;  %v1971_v52 = vld [vmem:[%s2576_s4 + $0x8] sm:$0xff]  }
 0x451   : > { %2007 = vpow2.f32 %v897_v53 }
 0x452   : > { %2009 = vpow2.f32 %v891_v46  ;;  %v1970_v46 = vld [vmem:[%s2576_s4 + $0x10] sm:$0xff]  }
 0x453   : > { %2011 = vpow2.f32 %v893_v54 }
 0x454   : > { %2013 = vpow2.f32 %v903_v56  ;;  %v1972_v56 = vld [vmem:[%s2576_s4] sm:$0xff]  }
 0x455   : > { %2015 = vpow2.f32 %v905_v59 }
 0x456   : > { %2017 = vpow2.f32 %v899_v60 }
 0x457   : > { %2019 = vpow2.f32 %v901_v61 }
 0x45d   : > { %v2006_v62 = vpop.eup %2005 }
 0x45e   : > { %v2008_v63 = vpop.eup %2007  ;;  %v913_v2 = vsel %vm740_vm3, %v2006_v62, 0.0 }
 0x45f   : > { %v2010_v3 = vpop.eup %2009  ;;  %914 = vadd.xlane.f32.xlu1 %v913_v2  ;;  %v916_v4 = vsel %vm740_vm3, %v2008_v63, 0.0 }
 0x460   : > { %v2012_v5 = vpop.eup %2011  ;;  %917 = vadd.xlane.f32.xlu0 %v916_v4  ;;  %v907_v6 = vsel %vm740_vm3, %v2010_v3, 0.0 }
 0x461   : > { %v2014_v8 = vpop.eup %2013  ;;  %v910_v9 = vsel %vm740_vm3, %v2012_v5, 0.0 }
 0x462   : > { %v2016_v10 = vpop.eup %2015  ;;  %v925_v11 = vsel %vm740_vm3, %v2014_v8, 0.0 }
 0x463   : > { %908 = vadd.xlane.f32.xlu1 %v907_v6  ;;  %v2018_v12 = vpop.eup %2017  ;;  %v928_v13 = vsel %vm740_vm3, %v2016_v10, 0.0 }
 0x464   : > { %911 = vadd.xlane.f32.xlu0 %v910_v9  ;;  %v2020_v14 = vpop.eup %2019  ;;  %v919_v15 = vsel %vm740_vm3, %v2018_v12, 0.0 }
 0x465   : > { %v922_v16 = vsel %vm740_vm3, %v2020_v14, 0.0 }
 0x467   : > { %926 = vadd.xlane.f32.xlu1 %v925_v11 }
 0x468   : > { %929 = vadd.xlane.f32.xlu0 %v928_v13 }
 0x46b   : > { %920 = vadd.xlane.f32.xlu1 %v919_v15 }
 0x46c   : > { %923 = vadd.xlane.f32.xlu0 %v922_v16 }
 0x47c   : > { %1009 = vrot.lane.b32.xlu1 %v2322_v51, %s2586_s18 }
 0x482   : > { %951 = vrot.lane.b32.xlu0 %v2315_v50, %s2586_s18 }
 0x4e8   : > { %v915_v17 = vpop.xlane.xlu1 %914 }
 0x4e9   : > { %v918_v18 = vpop.xlane.xlu0 %917  ;;  %2021 = vrcp.f32 %v915_v17 }
 0x4ea   : > { %2023 = vrcp.f32 %v918_v18 }
 0x4ec   : > { %v909_v19 = vpop.xlane.xlu1 %908 }
 0x4ed   : > { %2025 = vrcp.f32 %v909_v19  ;;  %v912_v20 = vpop.xlane.xlu0 %911 }
 0x4ee   : > { %2027 = vrcp.f32 %v912_v20 }
 0x4f0   : > { %v927_v21 = vpop.xlane.xlu1 %926 }
 0x4f1   : > { %v930_v22 = vpop.xlane.xlu0 %929  ;;  %2029 = vrcp.f32 %v927_v21 }
 0x4f2   : > { %2031 = vrcp.f32 %v930_v22 }
 0x4f4   : > { %v921_v23 = vpop.xlane.xlu1 %920 }
 0x4f5   : > { %2033 = vrcp.f32 %v921_v23  ;;  %v924_v24 = vpop.xlane.xlu0 %923 }
 0x4f6   : > { %2035 = vrcp.f32 %v924_v24  ;;  %v2022_v51 = vpop.eup %2021 }
 0x4f7   : > { %v2024_v25 = vpop.eup %2023  ;;  %v941_v31 = vmul.f32 %v2022_v51, %v2006_v62 }
 0x4f8   : > { %v1010_v26 = vpop.permute.xlu1 %1009  ;;  %v942_v30 = vmul.f32 %v2024_v25, %v2008_v63 }
 0x4f9   : > { %v952_v50 = vpop.permute.xlu0 %951  ;;  %1865 = vmatprep.subr.bf16.mxu1 %v1010_v26 }
 0x4fa   : > { %v2026_v27 = vpop.eup %2025  ;;  %1859 = vmatprep.subr.bf16.mxu0 %v952_v50  ;;  %1866 = vmatpush3.bf16.msra.mxu1 %v1010_v26  ;;  %v948_v35 = vpack.c.bf16 %v942_v30, %v941_v31  ;;  %v1979_v31 = vld [vmem:[%s2577_s5 + $0x18] ss:$12 sps:$4 sm:$0xff]  }
 0x4fb   : > { %v2028_v28 = vpop.eup %2027  ;;  %1860 = vmatpush3.bf16.msra.mxu0 %v952_v50  ;;  %v939_v29 = vmul.f32 %v2026_v27, %v2010_v3  ;;  %v1973_v27 = vld [vmem:[%s2577_s5 + $0x48] ss:$12 sps:$4 sm:$0xff]   ;;  %v1984_v30 = vld [vmem:[%s2577_s5 + $0x4] ss:$12 sps:$4 sm:$0xff]  }
 0x4fc   : > { %v940_v32 = vmul.f32 %v2028_v28, %v2012_v5  ;;  %1871 = vmatprep.subr.bf16.mxu0 %v2119_v7  ;;  %v1976_v28 = vld [vmem:[%s2577_s5 + $0x30] ss:$12 sps:$4 sm:$0xff]  }
 0x4fe   : > { %v947_v33 = vpack.c.bf16 %v940_v32, %v939_v29  ;;  %v2030_v34 = vpop.eup %2029  ;;  %v1981_v29 = vld [vmem:[%s2577_s5 + $0x1c] ss:$12 sps:$4 sm:$0xff]   ;;  %v1982_v32 = vld [vmem:[%s2577_s5] ss:$12 sps:$4 sm:$0xff]  }
 0x4ff   : > { %v2032_v36 = vpop.eup %2031  ;;  %v945_v40 = vmul.f32 %v2030_v34, %v2014_v8 }
 0x500   : > { %1861 = vmatprep.mubr.msk.bf16.mxu0 %vm740_vm3, %v947_v33  ;;  %v946_v41 = vmul.f32 %v2032_v36, %v2016_v10  ;;  %v2130_v33 = vmov 0  }
 0x501   : > { %1862 = vmatmul.mubr.msk.bf16.vlgmr.msra.gmra.mxu0 %vm740_vm3, %v948_v35  ;;  %1522 = vmatprep.subr.bf16.mxu1 %v2130_v33 }
 0x502   : > { %v2034_v37 = vpop.eup %2033  ;;  %1879 = vmatprep.mubr.msk.bf16.mxu0 %vm2120_vm1, %v2119_v7  ;;  %v950_v44 = vpack.c.bf16 %v946_v41, %v945_v40  ;;  %1872 = vmatpush3.bf16.msra.mxu0 %v1969_v45 }
 0x503   : > { %v2036_v38 = vpop.eup %2035  ;;  %v943_v39 = vmul.f32 %v2034_v37, %v2018_v12  ;;  %1873 = vmatprep.subr.bf16.mxu0 %v2119_v7 }
 0x504   : > { %v944_v42 = vmul.f32 %v2036_v38, %v2020_v14 }
 0x506   : > { %v949_v43 = vpack.c.bf16 %v944_v42, %v943_v39  ;;  %1874 = vmatpush3.bf16.msra.mxu0 %v1970_v46 }
 0x507   : > { %1875 = vmatprep.subr.bf16.mxu0 %v2119_v7 }
 0x508   : > { %1867 = vmatprep.mubr.msk.bf16.mxu1 %vm740_vm3, %v949_v43  ;;  %v1765_v43 = vld [vmem:[%s2574_s2] ss:$0 sm:$0xff] }
 0x509   : > { %1868 = vmatmul.mubr.msk.bf16.vlgmr.msra.gmra.mxu1 %vm740_vm3, %v950_v44 }
 0x50a   : > { %1876 = vmatpush3.bf16.msra.mxu0 %v1971_v52 }
 0x50b   : > { %1877 = vmatprep.subr.bf16.mxu0 %v2119_v7 }
 0x50e   : > { %1878 = vmatpush3.bf16.msra.mxu0 %v1972_v56  ;;  %v1989_v56 = vld [vmem:[%s2578_s6 + $0x38] sm:$0xff]  }
 0x50f   : > { %1523 = vmatpush1.bf16.msra.mxu1 %v1989_v56 }
 0x510   : > { %1524 = vmatprep.subr.bf16.mxu1 %v2130_v33 }
 0x5c1   : > { %v1863_v47 = vpop.f32.mrf.mxu0 }
 0x5c3   : > { %v994_v53 = vpop.f32.mrf.mxu0 }
 0x5c5   : > { %v1864_v54 = vpop.f32.mrf.mxu0 }
 0x5c6   : > { %v1950_v55 = vpack.i.bf16 %v1864_v54, %v1863_v47  ;;  %v1985_v47 = vld [vmem:[%s2577_s5 + $0x50] ss:$12 sps:$4 sm:$0xff]   ;;  %v1987_v54 = vld [vmem:[%s2577_s5 + $0x20] ss:$12 sps:$4 sm:$0xff]  }
 0x5c7   : > { %v997_v6 = vpop.f32.mrf.mxu0 }
 0x5c8   : > { %1951 = vrot.lane.b32.xlu1 %v1950_v55, %s2128_s21  ;;  %v1988_v55 = vld [vmem:[%s2577_s5 + $0x8] ss:$12 sps:$4 sm:$0xff]  }
 0x5c9   : > { %v1869_v57 = vpop.f32.mrf.mxu1 }
 0x5cb   : > { %v1052_v58 = vpop.f32.mrf.mxu1 }
 0x5cd   : > { %v1870_v59 = vpop.f32.mrf.mxu1 }
 0x5ce   : > { %v1960_v60 = vpack.i.bf16 %v1870_v59, %v1869_v57  ;;  %v1990_v57 = vld [vmem:[%s2578_s6 + $0x30] sm:$0xff]   ;;  %v1993_v59 = vld [vmem:[%s2578_s6 + $0x18] sm:$0xff]  }
 0x5cf   : > { %v1055_v61 = vpop.f32.mrf.mxu1  ;;  %1525 = vmatpush1.bf16.msra.mxu1 %v1990_v57 }
 0x5d0   : > { %v1955_v62 = vpack.i.bf16 %v1055_v61, %v1052_v58  ;;  %1961 = vrot.lane.b32.xlu0 %v1960_v60, %s2129_s22  ;;  %v1991_v58 = vld [vmem:[%s2578_s6 + $0x28] sm:$0xff]   ;;  %1526 = vmatprep.subr.bf16.mxu1 %v2130_v33  ;;  %v1994_v60 = vld [vmem:[%s2578_s6 + $0x10] sm:$0xff]  }
 0x5d1   : > { %v1995_v61 = vld [vmem:[%s2578_s6 + $0x8] sm:$0xff]  }
 0x5d2   : > { %1956 = vrot.lane.b32.xlu1 %v1955_v62, %s2586_s18  ;;  %v1996_v62 = vld [vmem:[%s2578_s6] sm:$0xff]   ;;  %s462_s18 = sand.u32 1, %s2109_s26  }
 0x5d3   : > { %1527 = vmatpush1.bf16.msra.mxu1 %v1991_v58  ;;  %s1737_s22 = sshll.u32 %s462_s18, 4  ;;  %s2532_s10 = scalar_lea.sflag [#allocation3], %s462_s18 }
 0x5d4   : > { %1528 = vmatprep.subr.bf16.mxu1 %v2130_v33  ;;  %s464_s23 = scalar_lea.vmem [#allocation2], %s1737_s22 }
 0x63a   : > { %v1952_v63 = vpop.permute.xlu1 %1951 }
 0x63b   : > { %v1954_v2 = vunpack.i.h.bf16 %v1952_v63  ;;  %v1953_v3 = vunpack.i.l.bf16 %v1952_v63  ;;  %v1997_v63 = vld [vmem:[%s2578_s6 + $0x58] sm:$0xff]  }
 0x63d   : > { %v1091_v10 = vsel %vm740_vm3, %v994_v53, %v1953_v3  ;;  %v1092_v11 = vsel %vm740_vm3, %v997_v6, %v1954_v2  ;;  %v1986_v53 = vld [vmem:[%s2577_s5 + $0x38] ss:$12 sps:$4 sm:$0xff]   ;;  %v1998_v2 = vld [vmem:[%s2578_s6 + $0x50] sm:$0xff]  }
 0x63e   : > { %v2000_v6 = vld [vmem:[%s2578_s6 + $0x40] sm:$0xff]  }
 0x642   : > { %v1962_v4 = vpop.permute.xlu0 %1961 }
 0x643   : > { %v1964_v12 = vunpack.i.h.bf16 %v1962_v4  ;;  %v1963_v13 = vunpack.i.l.bf16 %v1962_v4 }
 0x644   : > { %v1957_v5 = vpop.permute.xlu1 %1956 }
 0x645   : > { %v1959_v8 = vunpack.i.h.bf16 %v1957_v5  ;;  %v1958_v9 = vunpack.i.l.bf16 %v1957_v5  ;;  %v1999_v5 = vld [vmem:[%s2578_s6 + $0x48] sm:$0xff]  }
 0x647   : > { %v1094_v14 = vsel %vm1093_vm8, %v1091_v10, %v1958_v9  ;;  %v1095_v15 = vsel %vm1093_vm8, %v1092_v11, %v1959_v8 }
 0x648   : > { %v1097_v16 = vsel %vm1096_vm9, %v1094_v14, %v1963_v13  ;;  %v1098_v17 = vsel %vm1096_vm9, %v1095_v15, %v1964_v12  ;;  %v1805_v14 = vpack.c.bf16 %v2309_v48, %v2309_v48  ;;  %v1806_v15 = vpack.c.bf16 %v2311_v49, %v2311_v49 }
 0x649   : > { %v1099_v18 = vpack.c.bf16 %v1098_v17, %v1097_v16 }
 0x64b   : > { %1880 = vmatmul.mubr.msk.bf16.vlgmr.msra.gmra.mxu0 %vm510_vm0, %v1099_v18 }
 0x64c   : > { %1319 = vmatprep.mubr.bf16.mxu0 %v2130_v33 }
 0x70b   : > { %v1169_v19 = vpop.f32.mrf.mxu0 }
 0x70c   : > { %v2387_v20 = vadd.f32 %v1169_v19, %v2260_v0  ;;  %v1975_v0 = vld [vmem:[%s2577_s5 + $0x4c] ss:$12 sps:$4 sm:$0xff]  }
 0x70d   : > { %v1881_v21 = vpop.f32.mrf.mxu0  ;;  %1295 = vmatprep.subr.bf16.mxu0 %v1975_v0 }
 0x70e   : > { %v1179_v22 = vmul.f32 %v2387_v20, %v2387_v20  ;;  %1296 = vmatpush1.bf16.msra.mxu0 %v1973_v27 }
 0x70f   : > { %v1172_v23 = vpop.f32.mrf.mxu0 }
 0x710   : > { %v2392_v24 = vadd.f32 %v1172_v23, %v2262_v1  ;;  %v1181_v51 = vsel %vm510_vm0, %v1179_v22, 0.0  ;;  %v1978_v1 = vld [vmem:[%s2577_s5 + $0x34] ss:$12 sps:$4 sm:$0xff]  }
 0x711   : > { %1182 = vadd.xlane.f32.xlu1 %v1181_v51  ;;  %v1882_v25 = vpop.f32.mrf.mxu0  ;;  %1297 = vmatprep.subr.bf16.mxu0 %v1978_v1 }
 0x712   : > { %v1180_v26 = vmul.f32 %v2392_v24, %v2392_v24  ;;  %1298 = vmatpush1.bf16.msra.mxu0 %v1976_v28 }
 0x713   : > { %1299 = vmatprep.subr.bf16.mxu0 %v1981_v29 }
 0x714   : > { %v1184_v50 = vsel %vm510_vm0, %v1180_v26, 0.0 }
 0x715   : > { %1185 = vadd.xlane.f32.xlu0 %v1184_v50 }
 0x716   : > { %1300 = vmatpush1.bf16.msra.mxu0 %v1979_v31 }
 0x717   : > { %1301 = vmatprep.subr.bf16.mxu0 %v1984_v30 }
 0x71a   : > { %1302 = vmatpush1.bf16.msra.mxu0 %v1982_v32 }
 0x71b   : > { %1883 = vmatprep.subr.bf16.mxu0 %v2119_v7 }
 0x79a   : > { %v1183_v34 = vpop.xlane.xlu1 %1182 }
 0x79b   : > { %v1187_v35 = vmul.f32 0.015625, %v1183_v34 }
 0x79d   : > { %v1189_v36 = vadd.f32 1e-05, %v1187_v35 }
 0x79e   : > { %v1186_v37 = vpop.xlane.xlu0 %1185 }
 0x79f   : > { %2037 = vrsqrt.f32 %v1189_v36  ;;  %v1188_v38 = vmul.f32 0.015625, %v1186_v37 }
 0x7a1   : > { %v1190_v39 = vadd.f32 1e-05, %v1188_v38 }
 0x7a3   : > { %2039 = vrsqrt.f32 %v1190_v39 }
 0x7ac   : > { %v2038_v40 = vpop.eup %2037 }
 0x7ad   : > { %v1193_v41 = vmul.f32 %v2038_v40, %v2387_v20 }
 0x7af   : > { %v1201_v45 = vmul.f32 %v1765_v43, %v1193_v41 }
 0x7b0   : > { %v2040_v42 = vpop.eup %2039 }
 0x7b1   : > { %v1194_v44 = vmul.f32 %v2040_v42, %v2392_v24 }
 0x7b3   : > { %v1202_v46 = vmul.f32 %v1765_v43, %v1194_v44 }
 0x7b5   : > { %v1203_v52 = vpack.c.bf16 %v1202_v46, %v1201_v45 }
 0x7b7   : > { %1778 = vmatmul.mubr.msk.bf16.vlgmr.msra.gmra.mxu0 %vm510_vm0, %v1203_v52 }
 0x7b8   : > { %1884 = vmatpush3.bf16.msra.mxu0 %v1985_v47  ;;  %1891 = vmatprep.mubr.msk.bf16.mxu0 %vm2120_vm1, %v2119_v7 }
 0x7b9   : > { %1885 = vmatprep.subr.bf16.mxu0 %v2119_v7 }
 0x7bc   : > { %1886 = vmatpush3.bf16.msra.mxu0 %v1986_v53 }
 0x7bd   : > { %1887 = vmatprep.subr.bf16.mxu0 %v2119_v7 }
 0x7c0   : > { %1888 = vmatpush3.bf16.msra.mxu0 %v1987_v54 }
 0x7c1   : > { %1889 = vmatprep.subr.bf16.mxu0 %v2119_v7  ;;  %v1992_v7 = vld [vmem:[%s2578_s6 + $0x20] sm:$0xff]  }
 0x7c2   : > { %1529 = vmatpush1.bf16.msra.mxu1 %v1992_v7 }
 0x7c3   : > { %1530 = vmatprep.subr.bf16.mxu1 %v2130_v33 }
 0x7c4   : > { %1890 = vmatpush3.bf16.msra.mxu0 %v1988_v55 }
 0x7c6   : > { %1531 = vmatpush1.bf16.msra.mxu1 %v1993_v59 }
 0x7c7   : > { %1892 = vmatmul.mubr.msk.bf16.vlgmr.msra.gmra.mxu0 %vm510_vm0, %v1203_v52  ;;  %1532 = vmatprep.subr.bf16.mxu1 %v2130_v33 }
 0x7ca   : > { %1533 = vmatpush1.bf16.msra.mxu1 %v1994_v60 }
 0x7cb   : > { %1534 = vmatprep.subr.bf16.mxu1 %v2130_v33 }
 0x7ce   : > { %1535 = vmatpush1.bf16.msra.mxu1 %v1995_v61 }
 0x7cf   : > { %1536 = vmatprep.subr.bf16.mxu1 %v2130_v33 }
 0x7d2   : > { %1537 = vmatpush1.bf16.msra.mxu1 %v1996_v62 }
 0x7d3   : > { %1546 = vmatprep.subr.bf16.mxu1 %v2130_v33 }
 0x7d6   : > { %1547 = vmatpush2.bf16.msra.mxu1 %v1997_v63 }
 0x7d7   : > { %1548 = vmatprep.subr.bf16.mxu1 %v2130_v33 }
 0x7da   : > { %1549 = vmatpush2.bf16.msra.mxu1 %v1998_v2 }
 0x7db   : > { %1550 = vmatprep.subr.bf16.mxu1 %v2130_v33 }
 0x7de   : > { %1551 = vmatpush2.bf16.msra.mxu1 %v1999_v5 }
 0x7df   : > { %1552 = vmatprep.subr.bf16.mxu1 %v2130_v33 }
 0x7e2   : > { %1553 = vmatpush2.bf16.msra.mxu1 %v2000_v6 }
 0x877   : > { %v1321_v3 = vpop.f32.mrf.mxu0 }
 0x878   : > { %v1780_v16 = vmul.f32 -1.442695, %v1321_v3 }
 0x879   : > { %v1323_v4 = vpop.f32.mrf.mxu0 }
 0x87a   : > { %1403 = vrot.lane.b32.xlu0 %v1323_v4, %s2594_s0  ;;  %v1781_v17 = vmul.f32 -1.442695, %v1323_v4  ;;  %2041 = vpow2.f32 %v1780_v16 }
 0x87b   : > { %v1325_v8 = vpop.f32.mrf.mxu0 }
 0x87c   : > { %v1782_v19 = vmul.f32 -1.442695, %v1325_v8  ;;  %2043 = vpow2.f32 %v1781_v17 }
 0x87d   : > { %v1327_v9 = vpop.f32.mrf.mxu0 }
 0x87e   : > { %v1783_v18 = vmul.f32 -1.442695, %v1327_v9 }
 0x880   : > { %2045 = vpow2.f32 %v1783_v18 }
 0x881   : > { %2047 = vpow2.f32 %v1782_v19 }
 0x887   : > { %v1364_v10 = vpop.f32.mrf.mxu0  ;;  %v2042_v48 = vpop.eup %2041 }
 0x888   : > { %1405 = vrot.lane.b32.xlu1 %v1364_v10, %s2594_s0  ;;  %v1383_v23 = vadd.f32 1.0, %v2042_v48 }
 0x889   : > { %v1893_v11 = vpop.f32.mrf.mxu0  ;;  %v2044_v21 = vpop.eup %2043 }
 0x88a   : > { %v1384_v51 = vadd.f32 1.0, %v2044_v21  ;;  %2049 = vrcp.f32 %v1383_v23 }
 0x88b   : > { %v1367_v12 = vpop.f32.mrf.mxu0 }
 0x88c   : > { %1407 = vrot.lane.b32.xlu1 %v1327_v9, %s2594_s0  ;;  %1409 = vrot.lane.b32.xlu0 %v1367_v12, %s2594_s0  ;;  %2051 = vrcp.f32 %v1384_v51 }
 0x88d   : > { %v1894_v13 = vpop.f32.mrf.mxu0  ;;  %v2046_v22 = vpop.eup %2045 }
 0x88e   : > { %v2048_v49 = vpop.eup %2047  ;;  %v1386_v25 = vadd.f32 1.0, %v2046_v22 }
 0x88f   : > { %v1385_v26 = vadd.f32 1.0, %v2048_v49 }
 0x890   : > { %654 = vrot.lane.b32.xlu1 %v1805_v14, %s2594_s0  ;;  %656 = vrot.lane.b32.xlu0 %v1806_v15, %s2594_s0  ;;  %2053 = vrcp.f32 %v1386_v25  ;;  %s2131_s0 = smov [#allocation2]  }
 0x891   : > { %2055 = vrcp.f32 %v1385_v26 }
 0x894   : > { %663 = vrot.lane.b32.xlu1 %v1805_v14, %s2595_s24  ;;  %665 = vrot.lane.b32.xlu0 %v1806_v15, %s2595_s24  ;;  %s1591_s24 = sshll.u32 %s464_s23, 4  ;;  %s2523_s24 = int_to_ptr.vmem [resolvable:$true] %s1591_s24 }
 0x895   : > { %s2057_s21 = scalar_lea.vmem %s2523_s24, 256 }
 0x896   : > { %p2058_p11 = scmp.ne.s32.totalorder %s2523_s24, %s2057_s21 }
 0x897   : > { %v2050_v50 = vpop.eup %2049 }
 0x898   : > { %v1395_v33 = vmul.f32 %v2050_v50, %v1321_v3  ;;  %p2059_p12 = pnand %p2058_p11, %p2242_p5 }
 0x899   : > { %v2052_v0 = vpop.eup %2051 }
 0x89a   : > { %v1396_v31 = vmul.f32 %v2052_v0, %v1323_v4  ;;  %p2060_p13 = pneg %p2059_p12 }
 0x89d   : > { %v2054_v27 = vpop.eup %2053 }
 0x89e   : > { %v2056_v29 = vpop.eup %2055  ;;  %v1398_v30 = vmul.f32 %v2054_v27, %v1327_v9 }
 0x89f   : > { %v1397_v34 = vmul.f32 %v2056_v29, %v1325_v8 }
 0x8ec   : > { %v1404_v1 = vpop.permute.xlu0 %1403 }
 0x8fa   : > { %v1406_v28 = vpop.permute.xlu1 %1405 }
 0x8fb   : > { %v1411_v32 = vsel %vm510_vm0, %v1404_v1, %v1406_v28  ;;  %v1418_v37 = vmul.f32 %v1406_v28, %v1396_v31 }
 0x8fc   : > { %v1417_v40 = vmul.f32 %v1411_v32, %v1395_v33 }
 0x8fe   : > { %v1408_v35 = vpop.permute.xlu1 %1407  ;;  %v1410_v36 = vpop.permute.xlu0 %1409 }
 0x8ff   : > { %v1412_v38 = vsel %vm510_vm0, %v1408_v35, %v1410_v36  ;;  %v1420_v39 = vmul.f32 %v1410_v36, %v1398_v30 }
 0x900   : > { %v1419_v41 = vmul.f32 %v1412_v38, %v1397_v34 }
 0x901   : > { %v1422_v42 = vpack.c.bf16 %v1420_v39, %v1418_v37 }
 0x902   : > { %v1421_v43 = vpack.c.bf16 %v1419_v41, %v1417_v40  ;;  %v655_v44 = vpop.permute.xlu1 %654  ;;  %v657_v45 = vpop.permute.xlu0 %656 }
 0x903   : > { %661 = vst.msk [vmem:[%s498_s20] sm:$0xf] %vm660_vm10, %v655_v44  ;;  %662 = vst.msk [vmem:[%s498_s20 + $0x4] sm:$0xf] %vm660_vm10, %v657_v45  ;;  %1796 = vmatprep.mubr.msk.bf16.mxu1 %vm510_vm0, %v1422_v42  ;;  %s2528_s20 = scalar_lea.hbm %s2583_s11, %s1807_s28 }
 0x904   : > { %1555 = vmatmul.mubr.bf16.vlgmr.msra.gmra.mxu1 %v1421_v43 }
 0x906   : > { %v664_v46 = vpop.permute.xlu1 %663  ;;  %v666_v47 = vpop.permute.xlu0 %665 }
 0x907   : > { %669 = vst.msk [vmem:[%s503_s30] sm:$0xf] %vm660_vm10, %v664_v46  ;;  %670 = vst.msk [vmem:[%s503_s30 + $0x4] sm:$0xf] %vm660_vm10, %v666_v47  ;;  %s2061_s30 = sshll.u32 %s2131_s0, 4  ;;  %s2062_s30 = int_to_ptr.vmem [resolvable:$false] %s2061_s30 }
 0x908   : > { %s2063_s22 = scalar_lea.vmem %s2062_s30, 512  ;;  %p2064_p0 = scmp.lt.s32.totalorder %s2523_s24, %s2062_s30 }
 0x909   : > { %p2065_p1 = scmp.lt.s32.totalorder %s2063_s22, %s2057_s21 }
 0x90b   : > { %p2066_p2 = por %p2065_p1, %p2064_p0 }
 0x90d   : > { %p2067_p3 = pnand %p2066_p2, %p2060_p13 }
 0x9c4   : > { %v1556_v52 = vpop.f32.mrf.mxu1 }
 0x9c5   : > { %v1563_v53 = vadd.f32 %v1556_v52, %v2387_v20 }
 0x9c6   : > { %v1558_v54 = vpop.f32.mrf.mxu1 }
 0x9c7   : > { %1565 = vst.msk [vmem:[%s464_s23] sm:$0xff] %vm510_vm0, %v1563_v53 }
 0x9c8   : > { %v1559_v55 = vpop.f32.mrf.mxu1 }
 0x9c9   : > { %v1564_v56 = vadd.f32 %v1559_v55, %v2392_v24 }
 0x9ca   : > { %v1561_v20 = vpop.f32.mrf.mxu1 }
 0x9cb   : > { %1566 = vst.msk [vmem:[%s464_s23 + $0x8] sm:$0xff] %vm510_vm0, %v1564_v56 }
 0x9cc   : > { %2070 = shalt.err (!%p2067_p3)
}
 0x9cd   : > { %s2071_s18 = scalar_lea.hbm %s2528_s20, 256  ;;  %s2075_s19 = scalar_lea.hbm %s2583_s11, 512 }
 0x9ce   : > { %p2072_p4 = scmp.ne.s32.totalorder %s2528_s20, %s2071_s18  ;;  %p2076_p9 = scmp.lt.s32.totalorder %s2528_s20, %s2583_s11 }
 0x9cf   : > { %p2077_p10 = scmp.lt.s32.totalorder %s2075_s19, %s2071_s18 }
 0x9d0   : > { %p2073_p7 = pnand %p2072_p4, %p2242_p5 }
 0x9d1   : > { %p2078_p11 = por %p2077_p10, %p2076_p9 }
 0x9d2   : > { %p2074_p8 = pneg %p2073_p7 }
 0x9d4   : > { %p2079_p12 = pnand %p2078_p11, %p2074_p8 }
 0x9d6   : > { %2082 = shalt.err (!%p2079_p12)
}
 0x9d7   : > { %s2132_s21 = smov 128   ;;  %s2133_s30 = smov 8  }
 0x9d8   : > { %1897 = dma.vmem_to_hbm [thread:$0]  (%p2242_p5), %s2523_s24, 256, %s2528_s20, %s2532_s10, %s2132_s21, %s2132_s21, %s2133_s30  }
 0x9d9 PF: > { %p1903_p13 = scmp.ge.s32.totalorder %s2117_s9, 2  ;;  %s1612_s22 = sand.u32 1, %s2105_s25  }
 0x9da   : > { %s1613_s18 = scalar_lea.sflag [#allocation3], %s1612_s22 }
 0x9db   : > { %p1900_p0 = pnand %p1903_p13, %p2246_p6 }
 0x9dd   : > { %p1901_p1 = pneg %p1900_p0 }
 0x9df   : > { %2100 = dma.done.wait (%p1901_p1), %s1613_s18, 256  }
 0x9e0   : > { %2102 = vsyncadd (%p1901_p1), %s1613_s18, 4294967040  ;;  %p24_p2 = scmp.ge.s32.totalorder %s2229_s29, 4   ;;  %s2596_s25 = smov %s2109_s26 }
 0x9e1   : > { %s2597_s26 = smov %s2113_s27  ;;  %s2598_s27 = smov %s2240_s15 }
 0x9e2   : > { %s2599_s9 = smov %s2229_s29  ;;  %26 = sbr.rel (!%p24_p2) target bundleno = 5 (0x5), region = 129 }
 0x9e7   :  { %1634 = vsyncpa [#allocation3], 1 }
 0x9e8   :  { %1636 = vsyncpa [#allocation3 + $0x1], 1 }

</bundles_post_ra>
